<compile_context>
chip_gen: v7x
topology: tpu7x:2x2x1
jax: 0.10.0
libtpu: 0.0.40
codegen_flags: <defaults>
</compile_context>

<pallas_src>
import math

import jax
import jax.numpy as jnp
from jax.experimental import pallas as pl
from jax.experimental.pallas import tpu as pltpu


# ------------------------------ kernel ------------------------------------------
def make_forecast_kernel(nl, steps, H, G, T, B, od):
    """Builds the Pallas kernel closed over static sizes (G = 4*H, compacted gates)."""

    def kernel(*refs):
        it = iter(refs)
        gin0_ref = next(it)            # (T, B, G) f32 : x @ Wih_enc0^T + b, off-chain
        enc0_whh = next(it)            # (H, G) bf16
        enc_wih, enc_whh, enc_b = [], [], []
        for _ in range(nl - 1):
            enc_wih.append(next(it))   # (H, G) bf16
            enc_whh.append(next(it))   # (H, G) bf16
            enc_b.append(next(it))     # (1, G) f32
        dgin0_ref = next(it)           # (B, G) f32 : decoder step-0 input gates
        dec0_whh = next(it)            # (H, G) bf16
        dec_wstep = next(it)           # (H, G) bf16 : fc∘proj∘Wih_dec0 fused (steps>=1)
        dec_bstep = next(it)           # (1, G) f32
        dec_wih, dec_whh, dec_b = [], [], []
        for _ in range(nl - 1):
            dec_wih.append(next(it))
            dec_whh.append(next(it))
            dec_b.append(next(it))
        fc_wT = next(it)               # (H, od) f32
        fc_b = next(it)                # (1, od) f32
        out_ref = next(it)             # (steps*B, od) f32

        f32 = jnp.float32
        bf16 = jnp.bfloat16

        def mm(a, w_ref):
            # tiny (B,H) @ (H,G) recurrent dot; weights stored bf16, acc in f32
            return jnp.dot(a.astype(bf16), w_ref[...], preferred_element_type=f32)

        def nonlin(gates, c):
            # compacted PyTorch gate layout [i | f | g | o], each H lanes wide
            s = jax.nn.sigmoid(gates)              # one full-width EUP sigmoid
            g = jnp.tanh(gates[:, 2 * H:3 * H])    # one H-wide EUP tanh
            i = s[:, 0:H]
            f = s[:, H:2 * H]
            o = s[:, 3 * H:4 * H]
            c_new = f * c + i * g
            h_new = o * jnp.tanh(c_new)
            return h_new, c_new

        hs = [jnp.zeros((B, H), f32) for _ in range(nl)]
        cs = [jnp.zeros((B, H), f32) for _ in range(nl)]

        # ---------------------------- encoder -----------------------------------
        for t in range(T):                         # fully unrolled (T static)
            gates0 = gin0_ref[t] + mm(hs[0], enc0_whh)
            hs[0], cs[0] = nonlin(gates0, cs[0])
            for l in range(1, nl):
                gates = (mm(hs[l], enc_whh[l - 1])       # depends only on prev step
                         + mm(hs[l - 1], enc_wih[l - 1]) # fresh value on the chain
                         + enc_b[l - 1][...])
                hs[l], cs[l] = nonlin(gates, cs[l])

        # ---------------------------- decoder loop -------------------------------
        h_tops = []
        for s_ in range(steps):                    # fully unrolled (steps static)
            if s_ == 0:
                g_in = dgin0_ref[...]              # proj folded, precomputed off-chain
            else:
                # fc + proj + Wih_dec0 folded: one (B,H)@(H,G) dot from h_top
                g_in = mm(hs[nl - 1], dec_wstep) + dec_bstep[...]
            gates0 = g_in + mm(hs[0], dec0_whh)
            hs[0], cs[0] = nonlin(gates0, cs[0])
            for l in range(1, nl):
                gates = (mm(hs[l], dec_whh[l - 1])
                         + mm(hs[l - 1], dec_wih[l - 1])
                         + dec_b[l - 1][...])
                hs[l], cs[l] = nonlin(gates, cs[l])
            h_tops.append(hs[nl - 1])

        # fc entirely off the serial chain: one batched dot + one store
        h_all = jnp.concatenate(h_tops, axis=0)    # (steps*B, H)
        p = jnp.dot(h_all, fc_wT[...], preferred_element_type=f32) + fc_b[...]
        out_ref[...] = p

    return kernel


# ------------------------------ wrapper -----------------------------------------
def forecastnet_forward(x, params, nl, steps, hid, od):
    """Precomputes off-chain pieces, lays out compacted params, calls the kernel."""
    B, T, in_dim = x.shape
    enc, dec, (fc_w, fc_b), (proj_w, proj_b) = params
    H = hid
    G = 4 * hid
    hi = jax.lax.Precision.HIGHEST
    f32 = jnp.float32
    bf16 = jnp.bfloat16

    x = x.astype(f32)
    flat = []

    # encoder layer 0: input gates for all timesteps, hoisted off the recurrence
    wih0, whh0, bih0, bhh0 = enc[0]
    gin0 = jnp.einsum("bti,gi->tbg", x, wih0, precision=hi) + (bih0 + bhh0)
    flat += [gin0.astype(f32), whh0.T.astype(bf16)]
    for l in range(1, nl):
        wih, whh, bih, bhh = enc[l]
        flat += [wih.T.astype(bf16), whh.T.astype(bf16),
                 (bih + bhh).reshape(1, G).astype(f32)]

    # decoder layer 0: fold proj into the input path
    #   d @ Wih^T = inp @ (proj_w^T Wih^T) + proj_b @ Wih^T
    wihd0, whhd0, bihd0, bhhd0 = dec[0]
    A = jnp.dot(proj_w.T, wihd0.T, precision=hi)                    # (od, G)
    bA = jnp.dot(proj_b, wihd0.T, precision=hi) + bihd0 + bhhd0     # (G,)
    dgin0 = jnp.dot(x[:, -1, :2], A, precision=hi) + bA             # (B, G), step 0
    # steps >= 1: fold fc as well -> one (H, G) weight driven by h_top
    wstep = jnp.dot(fc_w.T, A, precision=hi)                        # (H, G)
    bstep = jnp.dot(fc_b, A, precision=hi) + bA                     # (G,)
    flat += [dgin0.astype(f32), whhd0.T.astype(bf16),
             wstep.astype(bf16), bstep.reshape(1, G).astype(f32)]
    for l in range(1, nl):
        wih, whh, bih, bhh = dec[l]
        flat += [wih.T.astype(bf16), whh.T.astype(bf16),
                 (bih + bhh).reshape(1, G).astype(f32)]

    flat += [fc_w.T.astype(f32), fc_b.reshape(1, od).astype(f32)]

    kernel = make_forecast_kernel(nl, steps, H, G, T, B, od)
    out_flat = pl.pallas_call(
        kernel,
        out_shape=jax.ShapeDtypeStruct((steps * B, od), f32),
        in_specs=[pl.BlockSpec(memory_space=pltpu.MemorySpace.VMEM)] * len(flat),
        out_specs=pl.BlockSpec(memory_space=pltpu.MemorySpace.VMEM),
    )(*flat)
    return jnp.transpose(out_flat.reshape(steps, B, od), (1, 0, 2))   # (B, steps, od)


# ----------------------- deterministic parameter init ---------------------------
def init_lstm(key, input_size, hidden, num_layers):
    k = 1.0 / math.sqrt(hidden)
    layers = []
    for l in range(num_layers):
        in_l = input_size if l == 0 else hidden
        key, k1, k2, k3, k4 = jax.random.split(key, 5)
        wih = jax.random.uniform(k1, (4 * hidden, in_l), jnp.float32, -k, k)
        whh = jax.random.uniform(k2, (4 * hidden, hidden), jnp.float32, -k, k)
        bih = jax.random.uniform(k3, (4 * hidden,), jnp.float32, -k, k)
        bhh = jax.random.uniform(k4, (4 * hidden,), jnp.float32, -k, k)
        layers.append((wih, whh, bih, bhh))
    return key, layers


# ---------------------------- pure-JAX reference --------------------------------
def reference_forward(x, params, nl, steps, hid, od):
    enc, dec, (fc_w, fc_b), (proj_w, proj_b) = params
    B, T, _ = x.shape

    def cell(xt, h, c, wih, whh, bih, bhh):
        g = xt @ wih.T + h @ whh.T + bih + bhh
        i, f, gg, o = jnp.split(g, 4, axis=-1)
        i, f, o = jax.nn.sigmoid(i), jax.nn.sigmoid(f), jax.nn.sigmoid(o)
        gg = jnp.tanh(gg)
        c = f * c + i * gg
        return o * jnp.tanh(c), c

    hs = [jnp.zeros((B, hid)) for _ in range(nl)]
    cs = [jnp.zeros((B, hid)) for _ in range(nl)]
    for t in range(T):
        xin = x[:, t, :]
        for l in range(nl):
            hs[l], cs[l] = cell(xin, hs[l], cs[l], *enc[l])
            xin = hs[l]
    inp = x[:, -1, :2]
    outs = []
    for _ in range(steps):
        d = inp @ proj_w.T + proj_b
        xin = d
        for l in range(nl):
            hs[l], cs[l] = cell(xin, hs[l], cs[l], *dec[l])
            xin = hs[l]
        p = xin @ fc_w.T + fc_b
        outs.append(p)
        inp = p
    return jnp.stack(outs, axis=1)


if __name__ == "__main__":
    B, T = 2, 8
    in_dim, hid, nl, steps, od = 2, 32, 2, 4, 2   # module forces in_dim == od == 2

    key = jax.random.PRNGKey(0)
    key, kx = jax.random.split(key)
    x = jax.random.normal(kx, (B, T, in_dim), jnp.float32)

    key, enc = init_lstm(key, in_dim, hid, nl)
    key, dec = init_lstm(key, od, hid, nl)
    kb = 1.0 / math.sqrt(hid)
    key, k1, k2 = jax.random.split(key, 3)
    fc_w = jax.random.uniform(k1, (od, hid), jnp.float32, -kb, kb)
    fc_b = jax.random.uniform(k2, (od,), jnp.float32, -kb, kb)
    kp = 1.0 / math.sqrt(od)
    key, k3, k4 = jax.random.split(key, 3)
    proj_w = jax.random.uniform(k3, (in_dim, od), jnp.float32, -kp, kp)
    proj_b = jax.random.uniform(k4, (in_dim,), jnp.float32, -kp, kp)
    params = (enc, dec, (fc_w, fc_b), (proj_w, proj_b))

    out = forecastnet_forward(x, params, nl, steps, hid, od)
    out = jax.block_until_ready(out)

    ref = reference_forward(x, params, nl, steps, hid, od)
    assert out.shape == (B, steps, od), out.shape
    assert jnp.allclose(out, ref, rtol=5e-3, atol=5e-3), float(jnp.abs(out - ref).max())
    print("KERNEL_OK")
</pallas_src>

<mosaic_0001>
module attributes {stable_mosaic.version = 11 : i64} {
  func.func @kernel(%arg0: memref<8x2x128xf32, #tpu.memory_space<vmem>>, %arg1: memref<32x128xbf16, #tpu.memory_space<vmem>>, %arg2: memref<32x128xbf16, #tpu.memory_space<vmem>>, %arg3: memref<32x128xbf16, #tpu.memory_space<vmem>>, %arg4: memref<1x128xf32, #tpu.memory_space<vmem>>, %arg5: memref<2x128xf32, #tpu.memory_space<vmem>>, %arg6: memref<32x128xbf16, #tpu.memory_space<vmem>>, %arg7: memref<32x128xbf16, #tpu.memory_space<vmem>>, %arg8: memref<1x128xf32, #tpu.memory_space<vmem>>, %arg9: memref<32x128xbf16, #tpu.memory_space<vmem>>, %arg10: memref<32x128xbf16, #tpu.memory_space<vmem>>, %arg11: memref<1x128xf32, #tpu.memory_space<vmem>>, %arg12: memref<32x2xf32, #tpu.memory_space<vmem>>, %arg13: memref<1x2xf32, #tpu.memory_space<vmem>>, %arg14: memref<8x2xf32, #tpu.memory_space<vmem>>) attributes {dimension_semantics = [], scalar_prefetch = 0 : i64, scratch_operands = 0 : i64, tpu.core_type = #tpu.core_type<tc>} {
    %cst = arith.constant 0.000000e+00 : f32
    %0 = vector.broadcast %cst : f32 to vector<2x32xf32>
    %cst_0 = arith.constant 0.000000e+00 : f32
    %1 = vector.broadcast %cst_0 : f32 to vector<2x32xf32>
    %cst_1 = arith.constant 0.000000e+00 : f32
    %2 = vector.broadcast %cst_1 : f32 to vector<2x32xf32>
    %cst_2 = arith.constant 0.000000e+00 : f32
    %3 = vector.broadcast %cst_2 : f32 to vector<2x32xf32>
    %c0 = arith.constant 0 : index
    %c0_3 = arith.constant 0 : index
    %c0_4 = arith.constant 0 : index
    %4 = vector.load %arg0[%c0, %c0_3, %c0_4] : memref<8x2x128xf32, #tpu.memory_space<vmem>>, vector<1x2x128xf32>
    %5 = vector.shape_cast %4 : vector<1x2x128xf32> to vector<2x128xf32>
    %6 = arith.truncf %0 : vector<2x32xf32> to vector<2x32xbf16>
    %c0_5 = arith.constant 0 : index
    %c0_6 = arith.constant 0 : index
    %7 = vector.load %arg1[%c0_5, %c0_6] : memref<32x128xbf16, #tpu.memory_space<vmem>>, vector<32x128xbf16>
    %cst_7 = arith.constant dense<0.000000e+00> : vector<2x128xf32>
    %8 = tpu.matmul %6, %7, %cst_7 {dimension_numbers = #tpu.dot_dimension_numbers<[1], [0], [0], [1], [0, 0, 1, 1], [], []>} : vector<2x32xbf16>, vector<32x128xbf16>, vector<2x128xf32> -> vector<2x128xf32>
    %9 = arith.addf %5, %8 : vector<2x128xf32>
    %10 = arith.negf %9 : vector<2x128xf32>
    %11 = math.exp %10 : vector<2x128xf32>
    %cst_8 = arith.constant 1.000000e+00 : f32
    %12 = vector.broadcast %cst_8 : f32 to vector<2x128xf32>
    %13 = arith.addf %12, %11 : vector<2x128xf32>
    %14 = arith.divf %12, %13 : vector<2x128xf32>
    %15 = vector.extract_strided_slice %9 {offsets = [0, 64], sizes = [2, 32], strides = [1, 1]} : vector<2x128xf32> to vector<2x32xf32>
    %16 = math.tanh %15 : vector<2x32xf32>
    %17 = vector.extract_strided_slice %14 {offsets = [0, 0], sizes = [2, 32], strides = [1, 1]} : vector<2x128xf32> to vector<2x32xf32>
    %18 = vector.extract_strided_slice %14 {offsets = [0, 32], sizes = [2, 32], strides = [1, 1]} : vector<2x128xf32> to vector<2x32xf32>
    %19 = vector.extract_strided_slice %14 {offsets = [0, 96], sizes = [2, 32], strides = [1, 1]} : vector<2x128xf32> to vector<2x32xf32>
    %20 = arith.mulf %18, %2 : vector<2x32xf32>
    %21 = arith.mulf %17, %16 : vector<2x32xf32>
    %22 = arith.addf %20, %21 : vector<2x32xf32>
    %23 = math.tanh %22 : vector<2x32xf32>
    %24 = arith.mulf %19, %23 : vector<2x32xf32>
    %25 = arith.truncf %1 : vector<2x32xf32> to vector<2x32xbf16>
    %c0_9 = arith.constant 0 : index
    %c0_10 = arith.constant 0 : index
    %26 = vector.load %arg3[%c0_9, %c0_10] : memref<32x128xbf16, #tpu.memory_space<vmem>>, vector<32x128xbf16>
    %cst_11 = arith.constant dense<0.000000e+00> : vector<2x128xf32>
    %27 = tpu.matmul %25, %26, %cst_11 {dimension_numbers = #tpu.dot_dimension_numbers<[1], [0], [0], [1], [0, 0, 1, 1], [], []>} : vector<2x32xbf16>, vector<32x128xbf16>, vector<2x128xf32> -> vector<2x128xf32>
    %28 = arith.truncf %24 : vector<2x32xf32> to vector<2x32xbf16>
    %c0_12 = arith.constant 0 : index
    %c0_13 = arith.constant 0 : index
    %29 = vector.load %arg2[%c0_12, %c0_13] : memref<32x128xbf16, #tpu.memory_space<vmem>>, vector<32x128xbf16>
    %cst_14 = arith.constant dense<0.000000e+00> : vector<2x128xf32>
    %30 = tpu.matmul %28, %29, %cst_14 {dimension_numbers = #tpu.dot_dimension_numbers<[1], [0], [0], [1], [0, 0, 1, 1], [], []>} : vector<2x32xbf16>, vector<32x128xbf16>, vector<2x128xf32> -> vector<2x128xf32>
    %31 = arith.addf %27, %30 : vector<2x128xf32>
    %c0_15 = arith.constant 0 : index
    %c0_16 = arith.constant 0 : index
    %32 = vector.load %arg4[%c0_15, %c0_16] : memref<1x128xf32, #tpu.memory_space<vmem>>, vector<1x128xf32>
    %33 = vector.broadcast %32 : vector<1x128xf32> to vector<2x128xf32>
    %34 = arith.addf %31, %33 : vector<2x128xf32>
    %35 = arith.negf %34 : vector<2x128xf32>
    %36 = math.exp %35 : vector<2x128xf32>
    %cst_17 = arith.constant 1.000000e+00 : f32
    %37 = vector.broadcast %cst_17 : f32 to vector<2x128xf32>
    %38 = arith.addf %37, %36 : vector<2x128xf32>
    %39 = arith.divf %37, %38 : vector<2x128xf32>
    %40 = vector.extract_strided_slice %34 {offsets = [0, 64], sizes = [2, 32], strides = [1, 1]} : vector<2x128xf32> to vector<2x32xf32>
    %41 = math.tanh %40 : vector<2x32xf32>
    %42 = vector.extract_strided_slice %39 {offsets = [0, 0], sizes = [2, 32], strides = [1, 1]} : vector<2x128xf32> to vector<2x32xf32>
    %43 = vector.extract_strided_slice %39 {offsets = [0, 32], sizes = [2, 32], strides = [1, 1]} : vector<2x128xf32> to vector<2x32xf32>
    %44 = vector.extract_strided_slice %39 {offsets = [0, 96], sizes = [2, 32], strides = [1, 1]} : vector<2x128xf32> to vector<2x32xf32>
    %45 = arith.mulf %43, %3 : vector<2x32xf32>
    %46 = arith.mulf %42, %41 : vector<2x32xf32>
    %47 = arith.addf %45, %46 : vector<2x32xf32>
    %48 = math.tanh %47 : vector<2x32xf32>
    %49 = arith.mulf %44, %48 : vector<2x32xf32>
    %c1 = arith.constant 1 : index
    %c0_18 = arith.constant 0 : index
    %c0_19 = arith.constant 0 : index
    %50 = vector.load %arg0[%c1, %c0_18, %c0_19] : memref<8x2x128xf32, #tpu.memory_space<vmem>>, vector<1x2x128xf32>
    %51 = vector.shape_cast %50 : vector<1x2x128xf32> to vector<2x128xf32>
    %52 = arith.truncf %24 : vector<2x32xf32> to vector<2x32xbf16>
    %c0_20 = arith.constant 0 : index
    %c0_21 = arith.constant 0 : index
    %53 = vector.load %arg1[%c0_20, %c0_21] : memref<32x128xbf16, #tpu.memory_space<vmem>>, vector<32x128xbf16>
    %cst_22 = arith.constant dense<0.000000e+00> : vector<2x128xf32>
    %54 = tpu.matmul %52, %53, %cst_22 {dimension_numbers = #tpu.dot_dimension_numbers<[1], [0], [0], [1], [0, 0, 1, 1], [], []>} : vector<2x32xbf16>, vector<32x128xbf16>, vector<2x128xf32> -> vector<2x128xf32>
    %55 = arith.addf %51, %54 : vector<2x128xf32>
    %56 = arith.negf %55 : vector<2x128xf32>
    %57 = math.exp %56 : vector<2x128xf32>
    %cst_23 = arith.constant 1.000000e+00 : f32
    %58 = vector.broadcast %cst_23 : f32 to vector<2x128xf32>
    %59 = arith.addf %58, %57 : vector<2x128xf32>
    %60 = arith.divf %58, %59 : vector<2x128xf32>
    %61 = vector.extract_strided_slice %55 {offsets = [0, 64], sizes = [2, 32], strides = [1, 1]} : vector<2x128xf32> to vector<2x32xf32>
    %62 = math.tanh %61 : vector<2x32xf32>
    %63 = vector.extract_strided_slice %60 {offsets = [0, 0], sizes = [2, 32], strides = [1, 1]} : vector<2x128xf32> to vector<2x32xf32>
    %64 = vector.extract_strided_slice %60 {offsets = [0, 32], sizes = [2, 32], strides = [1, 1]} : vector<2x128xf32> to vector<2x32xf32>
    %65 = vector.extract_strided_slice %60 {offsets = [0, 96], sizes = [2, 32], strides = [1, 1]} : vector<2x128xf32> to vector<2x32xf32>
    %66 = arith.mulf %64, %22 : vector<2x32xf32>
    %67 = arith.mulf %63, %62 : vector<2x32xf32>
    %68 = arith.addf %66, %67 : vector<2x32xf32>
    %69 = math.tanh %68 : vector<2x32xf32>
    %70 = arith.mulf %65, %69 : vector<2x32xf32>
    %71 = arith.truncf %49 : vector<2x32xf32> to vector<2x32xbf16>
    %c0_24 = arith.constant 0 : index
    %c0_25 = arith.constant 0 : index
    %72 = vector.load %arg3[%c0_24, %c0_25] : memref<32x128xbf16, #tpu.memory_space<vmem>>, vector<32x128xbf16>
    %cst_26 = arith.constant dense<0.000000e+00> : vector<2x128xf32>
    %73 = tpu.matmul %71, %72, %cst_26 {dimension_numbers = #tpu.dot_dimension_numbers<[1], [0], [0], [1], [0, 0, 1, 1], [], []>} : vector<2x32xbf16>, vector<32x128xbf16>, vector<2x128xf32> -> vector<2x128xf32>
    %74 = arith.truncf %70 : vector<2x32xf32> to vector<2x32xbf16>
    %c0_27 = arith.constant 0 : index
    %c0_28 = arith.constant 0 : index
    %75 = vector.load %arg2[%c0_27, %c0_28] : memref<32x128xbf16, #tpu.memory_space<vmem>>, vector<32x128xbf16>
    %cst_29 = arith.constant dense<0.000000e+00> : vector<2x128xf32>
    %76 = tpu.matmul %74, %75, %cst_29 {dimension_numbers = #tpu.dot_dimension_numbers<[1], [0], [0], [1], [0, 0, 1, 1], [], []>} : vector<2x32xbf16>, vector<32x128xbf16>, vector<2x128xf32> -> vector<2x128xf32>
    %77 = arith.addf %73, %76 : vector<2x128xf32>
    %c0_30 = arith.constant 0 : index
    %c0_31 = arith.constant 0 : index
    %78 = vector.load %arg4[%c0_30, %c0_31] : memref<1x128xf32, #tpu.memory_space<vmem>>, vector<1x128xf32>
    %79 = vector.broadcast %78 : vector<1x128xf32> to vector<2x128xf32>
    %80 = arith.addf %77, %79 : vector<2x128xf32>
    %81 = arith.negf %80 : vector<2x128xf32>
    %82 = math.exp %81 : vector<2x128xf32>
    %cst_32 = arith.constant 1.000000e+00 : f32
    %83 = vector.broadcast %cst_32 : f32 to vector<2x128xf32>
    %84 = arith.addf %83, %82 : vector<2x128xf32>
    %85 = arith.divf %83, %84 : vector<2x128xf32>
    %86 = vector.extract_strided_slice %80 {offsets = [0, 64], sizes = [2, 32], strides = [1, 1]} : vector<2x128xf32> to vector<2x32xf32>
    %87 = math.tanh %86 : vector<2x32xf32>
    %88 = vector.extract_strided_slice %85 {offsets = [0, 0], sizes = [2, 32], strides = [1, 1]} : vector<2x128xf32> to vector<2x32xf32>
    %89 = vector.extract_strided_slice %85 {offsets = [0, 32], sizes = [2, 32], strides = [1, 1]} : vector<2x128xf32> to vector<2x32xf32>
    %90 = vector.extract_strided_slice %85 {offsets = [0, 96], sizes = [2, 32], strides = [1, 1]} : vector<2x128xf32> to vector<2x32xf32>
    %91 = arith.mulf %89, %47 : vector<2x32xf32>
    %92 = arith.mulf %88, %87 : vector<2x32xf32>
    %93 = arith.addf %91, %92 : vector<2x32xf32>
    %94 = math.tanh %93 : vector<2x32xf32>
    %95 = arith.mulf %90, %94 : vector<2x32xf32>
    %c2 = arith.constant 2 : index
    %c0_33 = arith.constant 0 : index
    %c0_34 = arith.constant 0 : index
    %96 = vector.load %arg0[%c2, %c0_33, %c0_34] : memref<8x2x128xf32, #tpu.memory_space<vmem>>, vector<1x2x128xf32>
    %97 = vector.shape_cast %96 : vector<1x2x128xf32> to vector<2x128xf32>
    %98 = arith.truncf %70 : vector<2x32xf32> to vector<2x32xbf16>
    %c0_35 = arith.constant 0 : index
    %c0_36 = arith.constant 0 : index
    %99 = vector.load %arg1[%c0_35, %c0_36] : memref<32x128xbf16, #tpu.memory_space<vmem>>, vector<32x128xbf16>
    %cst_37 = arith.constant dense<0.000000e+00> : vector<2x128xf32>
    %100 = tpu.matmul %98, %99, %cst_37 {dimension_numbers = #tpu.dot_dimension_numbers<[1], [0], [0], [1], [0, 0, 1, 1], [], []>} : vector<2x32xbf16>, vector<32x128xbf16>, vector<2x128xf32> -> vector<2x128xf32>
    %101 = arith.addf %97, %100 : vector<2x128xf32>
    %102 = arith.negf %101 : vector<2x128xf32>
    %103 = math.exp %102 : vector<2x128xf32>
    %cst_38 = arith.constant 1.000000e+00 : f32
    %104 = vector.broadcast %cst_38 : f32 to vector<2x128xf32>
    %105 = arith.addf %104, %103 : vector<2x128xf32>
    %106 = arith.divf %104, %105 : vector<2x128xf32>
    %107 = vector.extract_strided_slice %101 {offsets = [0, 64], sizes = [2, 32], strides = [1, 1]} : vector<2x128xf32> to vector<2x32xf32>
    %108 = math.tanh %107 : vector<2x32xf32>
    %109 = vector.extract_strided_slice %106 {offsets = [0, 0], sizes = [2, 32], strides = [1, 1]} : vector<2x128xf32> to vector<2x32xf32>
    %110 = vector.extract_strided_slice %106 {offsets = [0, 32], sizes = [2, 32], strides = [1, 1]} : vector<2x128xf32> to vector<2x32xf32>
    %111 = vector.extract_strided_slice %106 {offsets = [0, 96], sizes = [2, 32], strides = [1, 1]} : vector<2x128xf32> to vector<2x32xf32>
    %112 = arith.mulf %110, %68 : vector<2x32xf32>
    %113 = arith.mulf %109, %108 : vector<2x32xf32>
    %114 = arith.addf %112, %113 : vector<2x32xf32>
    %115 = math.tanh %114 : vector<2x32xf32>
    %116 = arith.mulf %111, %115 : vector<2x32xf32>
    %117 = arith.truncf %95 : vector<2x32xf32> to vector<2x32xbf16>
    %c0_39 = arith.constant 0 : index
    %c0_40 = arith.constant 0 : index
    %118 = vector.load %arg3[%c0_39, %c0_40] : memref<32x128xbf16, #tpu.memory_space<vmem>>, vector<32x128xbf16>
    %cst_41 = arith.constant dense<0.000000e+00> : vector<2x128xf32>
    %119 = tpu.matmul %117, %118, %cst_41 {dimension_numbers = #tpu.dot_dimension_numbers<[1], [0], [0], [1], [0, 0, 1, 1], [], []>} : vector<2x32xbf16>, vector<32x128xbf16>, vector<2x128xf32> -> vector<2x128xf32>
    %120 = arith.truncf %116 : vector<2x32xf32> to vector<2x32xbf16>
    %c0_42 = arith.constant 0 : index
    %c0_43 = arith.constant 0 : index
    %121 = vector.load %arg2[%c0_42, %c0_43] : memref<32x128xbf16, #tpu.memory_space<vmem>>, vector<32x128xbf16>
    %cst_44 = arith.constant dense<0.000000e+00> : vector<2x128xf32>
    %122 = tpu.matmul %120, %121, %cst_44 {dimension_numbers = #tpu.dot_dimension_numbers<[1], [0], [0], [1], [0, 0, 1, 1], [], []>} : vector<2x32xbf16>, vector<32x128xbf16>, vector<2x128xf32> -> vector<2x128xf32>
    %123 = arith.addf %119, %122 : vector<2x128xf32>
    %c0_45 = arith.constant 0 : index
    %c0_46 = arith.constant 0 : index
    %124 = vector.load %arg4[%c0_45, %c0_46] : memref<1x128xf32, #tpu.memory_space<vmem>>, vector<1x128xf32>
    %125 = vector.broadcast %124 : vector<1x128xf32> to vector<2x128xf32>
    %126 = arith.addf %123, %125 : vector<2x128xf32>
    %127 = arith.negf %126 : vector<2x128xf32>
    %128 = math.exp %127 : vector<2x128xf32>
    %cst_47 = arith.constant 1.000000e+00 : f32
    %129 = vector.broadcast %cst_47 : f32 to vector<2x128xf32>
    %130 = arith.addf %129, %128 : vector<2x128xf32>
    %131 = arith.divf %129, %130 : vector<2x128xf32>
    %132 = vector.extract_strided_slice %126 {offsets = [0, 64], sizes = [2, 32], strides = [1, 1]} : vector<2x128xf32> to vector<2x32xf32>
    %133 = math.tanh %132 : vector<2x32xf32>
    %134 = vector.extract_strided_slice %131 {offsets = [0, 0], sizes = [2, 32], strides = [1, 1]} : vector<2x128xf32> to vector<2x32xf32>
    %135 = vector.extract_strided_slice %131 {offsets = [0, 32], sizes = [2, 32], strides = [1, 1]} : vector<2x128xf32> to vector<2x32xf32>
    %136 = vector.extract_strided_slice %131 {offsets = [0, 96], sizes = [2, 32], strides = [1, 1]} : vector<2x128xf32> to vector<2x32xf32>
    %137 = arith.mulf %135, %93 : vector<2x32xf32>
    %138 = arith.mulf %134, %133 : vector<2x32xf32>
    %139 = arith.addf %137, %138 : vector<2x32xf32>
    %140 = math.tanh %139 : vector<2x32xf32>
    %141 = arith.mulf %136, %140 : vector<2x32xf32>
    %c3 = arith.constant 3 : index
    %c0_48 = arith.constant 0 : index
    %c0_49 = arith.constant 0 : index
    %142 = vector.load %arg0[%c3, %c0_48, %c0_49] : memref<8x2x128xf32, #tpu.memory_space<vmem>>, vector<1x2x128xf32>
    %143 = vector.shape_cast %142 : vector<1x2x128xf32> to vector<2x128xf32>
    %144 = arith.truncf %116 : vector<2x32xf32> to vector<2x32xbf16>
    %c0_50 = arith.constant 0 : index
    %c0_51 = arith.constant 0 : index
    %145 = vector.load %arg1[%c0_50, %c0_51] : memref<32x128xbf16, #tpu.memory_space<vmem>>, vector<32x128xbf16>
    %cst_52 = arith.constant dense<0.000000e+00> : vector<2x128xf32>
    %146 = tpu.matmul %144, %145, %cst_52 {dimension_numbers = #tpu.dot_dimension_numbers<[1], [0], [0], [1], [0, 0, 1, 1], [], []>} : vector<2x32xbf16>, vector<32x128xbf16>, vector<2x128xf32> -> vector<2x128xf32>
    %147 = arith.addf %143, %146 : vector<2x128xf32>
    %148 = arith.negf %147 : vector<2x128xf32>
    %149 = math.exp %148 : vector<2x128xf32>
    %cst_53 = arith.constant 1.000000e+00 : f32
    %150 = vector.broadcast %cst_53 : f32 to vector<2x128xf32>
    %151 = arith.addf %150, %149 : vector<2x128xf32>
    %152 = arith.divf %150, %151 : vector<2x128xf32>
    %153 = vector.extract_strided_slice %147 {offsets = [0, 64], sizes = [2, 32], strides = [1, 1]} : vector<2x128xf32> to vector<2x32xf32>
    %154 = math.tanh %153 : vector<2x32xf32>
    %155 = vector.extract_strided_slice %152 {offsets = [0, 0], sizes = [2, 32], strides = [1, 1]} : vector<2x128xf32> to vector<2x32xf32>
    %156 = vector.extract_strided_slice %152 {offsets = [0, 32], sizes = [2, 32], strides = [1, 1]} : vector<2x128xf32> to vector<2x32xf32>
    %157 = vector.extract_strided_slice %152 {offsets = [0, 96], sizes = [2, 32], strides = [1, 1]} : vector<2x128xf32> to vector<2x32xf32>
    %158 = arith.mulf %156, %114 : vector<2x32xf32>
    %159 = arith.mulf %155, %154 : vector<2x32xf32>
    %160 = arith.addf %158, %159 : vector<2x32xf32>
    %161 = math.tanh %160 : vector<2x32xf32>
    %162 = arith.mulf %157, %161 : vector<2x32xf32>
    %163 = arith.truncf %141 : vector<2x32xf32> to vector<2x32xbf16>
    %c0_54 = arith.constant 0 : index
    %c0_55 = arith.constant 0 : index
    %164 = vector.load %arg3[%c0_54, %c0_55] : memref<32x128xbf16, #tpu.memory_space<vmem>>, vector<32x128xbf16>
    %cst_56 = arith.constant dense<0.000000e+00> : vector<2x128xf32>
    %165 = tpu.matmul %163, %164, %cst_56 {dimension_numbers = #tpu.dot_dimension_numbers<[1], [0], [0], [1], [0, 0, 1, 1], [], []>} : vector<2x32xbf16>, vector<32x128xbf16>, vector<2x128xf32> -> vector<2x128xf32>
    %166 = arith.truncf %162 : vector<2x32xf32> to vector<2x32xbf16>
    %c0_57 = arith.constant 0 : index
    %c0_58 = arith.constant 0 : index
    %167 = vector.load %arg2[%c0_57, %c0_58] : memref<32x128xbf16, #tpu.memory_space<vmem>>, vector<32x128xbf16>
    %cst_59 = arith.constant dense<0.000000e+00> : vector<2x128xf32>
    %168 = tpu.matmul %166, %167, %cst_59 {dimension_numbers = #tpu.dot_dimension_numbers<[1], [0], [0], [1], [0, 0, 1, 1], [], []>} : vector<2x32xbf16>, vector<32x128xbf16>, vector<2x128xf32> -> vector<2x128xf32>
    %169 = arith.addf %165, %168 : vector<2x128xf32>
    %c0_60 = arith.constant 0 : index
    %c0_61 = arith.constant 0 : index
    %170 = vector.load %arg4[%c0_60, %c0_61] : memref<1x128xf32, #tpu.memory_space<vmem>>, vector<1x128xf32>
    %171 = vector.broadcast %170 : vector<1x128xf32> to vector<2x128xf32>
    %172 = arith.addf %169, %171 : vector<2x128xf32>
    %173 = arith.negf %172 : vector<2x128xf32>
    %174 = math.exp %173 : vector<2x128xf32>
    %cst_62 = arith.constant 1.000000e+00 : f32
    %175 = vector.broadcast %cst_62 : f32 to vector<2x128xf32>
    %176 = arith.addf %175, %174 : vector<2x128xf32>
    %177 = arith.divf %175, %176 : vector<2x128xf32>
    %178 = vector.extract_strided_slice %172 {offsets = [0, 64], sizes = [2, 32], strides = [1, 1]} : vector<2x128xf32> to vector<2x32xf32>
    %179 = math.tanh %178 : vector<2x32xf32>
    %180 = vector.extract_strided_slice %177 {offsets = [0, 0], sizes = [2, 32], strides = [1, 1]} : vector<2x128xf32> to vector<2x32xf32>
    %181 = vector.extract_strided_slice %177 {offsets = [0, 32], sizes = [2, 32], strides = [1, 1]} : vector<2x128xf32> to vector<2x32xf32>
    %182 = vector.extract_strided_slice %177 {offsets = [0, 96], sizes = [2, 32], strides = [1, 1]} : vector<2x128xf32> to vector<2x32xf32>
    %183 = arith.mulf %181, %139 : vector<2x32xf32>
    %184 = arith.mulf %180, %179 : vector<2x32xf32>
    %185 = arith.addf %183, %184 : vector<2x32xf32>
    %186 = math.tanh %185 : vector<2x32xf32>
    %187 = arith.mulf %182, %186 : vector<2x32xf32>
    %c4 = arith.constant 4 : index
    %c0_63 = arith.constant 0 : index
    %c0_64 = arith.constant 0 : index
    %188 = vector.load %arg0[%c4, %c0_63, %c0_64] : memref<8x2x128xf32, #tpu.memory_space<vmem>>, vector<1x2x128xf32>
    %189 = vector.shape_cast %188 : vector<1x2x128xf32> to vector<2x128xf32>
    %190 = arith.truncf %162 : vector<2x32xf32> to vector<2x32xbf16>
    %c0_65 = arith.constant 0 : index
    %c0_66 = arith.constant 0 : index
    %191 = vector.load %arg1[%c0_65, %c0_66] : memref<32x128xbf16, #tpu.memory_space<vmem>>, vector<32x128xbf16>
    %cst_67 = arith.constant dense<0.000000e+00> : vector<2x128xf32>
    %192 = tpu.matmul %190, %191, %cst_67 {dimension_numbers = #tpu.dot_dimension_numbers<[1], [0], [0], [1], [0, 0, 1, 1], [], []>} : vector<2x32xbf16>, vector<32x128xbf16>, vector<2x128xf32> -> vector<2x128xf32>
    %193 = arith.addf %189, %192 : vector<2x128xf32>
    %194 = arith.negf %193 : vector<2x128xf32>
    %195 = math.exp %194 : vector<2x128xf32>
    %cst_68 = arith.constant 1.000000e+00 : f32
    %196 = vector.broadcast %cst_68 : f32 to vector<2x128xf32>
    %197 = arith.addf %196, %195 : vector<2x128xf32>
    %198 = arith.divf %196, %197 : vector<2x128xf32>
    %199 = vector.extract_strided_slice %193 {offsets = [0, 64], sizes = [2, 32], strides = [1, 1]} : vector<2x128xf32> to vector<2x32xf32>
    %200 = math.tanh %199 : vector<2x32xf32>
    %201 = vector.extract_strided_slice %198 {offsets = [0, 0], sizes = [2, 32], strides = [1, 1]} : vector<2x128xf32> to vector<2x32xf32>
    %202 = vector.extract_strided_slice %198 {offsets = [0, 32], sizes = [2, 32], strides = [1, 1]} : vector<2x128xf32> to vector<2x32xf32>
    %203 = vector.extract_strided_slice %198 {offsets = [0, 96], sizes = [2, 32], strides = [1, 1]} : vector<2x128xf32> to vector<2x32xf32>
    %204 = arith.mulf %202, %160 : vector<2x32xf32>
    %205 = arith.mulf %201, %200 : vector<2x32xf32>
    %206 = arith.addf %204, %205 : vector<2x32xf32>
    %207 = math.tanh %206 : vector<2x32xf32>
    %208 = arith.mulf %203, %207 : vector<2x32xf32>
    %209 = arith.truncf %187 : vector<2x32xf32> to vector<2x32xbf16>
    %c0_69 = arith.constant 0 : index
    %c0_70 = arith.constant 0 : index
    %210 = vector.load %arg3[%c0_69, %c0_70] : memref<32x128xbf16, #tpu.memory_space<vmem>>, vector<32x128xbf16>
    %cst_71 = arith.constant dense<0.000000e+00> : vector<2x128xf32>
    %211 = tpu.matmul %209, %210, %cst_71 {dimension_numbers = #tpu.dot_dimension_numbers<[1], [0], [0], [1], [0, 0, 1, 1], [], []>} : vector<2x32xbf16>, vector<32x128xbf16>, vector<2x128xf32> -> vector<2x128xf32>
    %212 = arith.truncf %208 : vector<2x32xf32> to vector<2x32xbf16>
    %c0_72 = arith.constant 0 : index
    %c0_73 = arith.constant 0 : index
    %213 = vector.load %arg2[%c0_72, %c0_73] : memref<32x128xbf16, #tpu.memory_space<vmem>>, vector<32x128xbf16>
    %cst_74 = arith.constant dense<0.000000e+00> : vector<2x128xf32>
    %214 = tpu.matmul %212, %213, %cst_74 {dimension_numbers = #tpu.dot_dimension_numbers<[1], [0], [0], [1], [0, 0, 1, 1], [], []>} : vector<2x32xbf16>, vector<32x128xbf16>, vector<2x128xf32> -> vector<2x128xf32>
    %215 = arith.addf %211, %214 : vector<2x128xf32>
    %c0_75 = arith.constant 0 : index
    %c0_76 = arith.constant 0 : index
    %216 = vector.load %arg4[%c0_75, %c0_76] : memref<1x128xf32, #tpu.memory_space<vmem>>, vector<1x128xf32>
    %217 = vector.broadcast %216 : vector<1x128xf32> to vector<2x128xf32>
    %218 = arith.addf %215, %217 : vector<2x128xf32>
    %219 = arith.negf %218 : vector<2x128xf32>
    %220 = math.exp %219 : vector<2x128xf32>
    %cst_77 = arith.constant 1.000000e+00 : f32
    %221 = vector.broadcast %cst_77 : f32 to vector<2x128xf32>
    %222 = arith.addf %221, %220 : vector<2x128xf32>
    %223 = arith.divf %221, %222 : vector<2x128xf32>
    %224 = vector.extract_strided_slice %218 {offsets = [0, 64], sizes = [2, 32], strides = [1, 1]} : vector<2x128xf32> to vector<2x32xf32>
    %225 = math.tanh %224 : vector<2x32xf32>
    %226 = vector.extract_strided_slice %223 {offsets = [0, 0], sizes = [2, 32], strides = [1, 1]} : vector<2x128xf32> to vector<2x32xf32>
    %227 = vector.extract_strided_slice %223 {offsets = [0, 32], sizes = [2, 32], strides = [1, 1]} : vector<2x128xf32> to vector<2x32xf32>
    %228 = vector.extract_strided_slice %223 {offsets = [0, 96], sizes = [2, 32], strides = [1, 1]} : vector<2x128xf32> to vector<2x32xf32>
    %229 = arith.mulf %227, %185 : vector<2x32xf32>
    %230 = arith.mulf %226, %225 : vector<2x32xf32>
    %231 = arith.addf %229, %230 : vector<2x32xf32>
    %232 = math.tanh %231 : vector<2x32xf32>
    %233 = arith.mulf %228, %232 : vector<2x32xf32>
    %c5 = arith.constant 5 : index
    %c0_78 = arith.constant 0 : index
    %c0_79 = arith.constant 0 : index
    %234 = vector.load %arg0[%c5, %c0_78, %c0_79] : memref<8x2x128xf32, #tpu.memory_space<vmem>>, vector<1x2x128xf32>
    %235 = vector.shape_cast %234 : vector<1x2x128xf32> to vector<2x128xf32>
    %236 = arith.truncf %208 : vector<2x32xf32> to vector<2x32xbf16>
    %c0_80 = arith.constant 0 : index
    %c0_81 = arith.constant 0 : index
    %237 = vector.load %arg1[%c0_80, %c0_81] : memref<32x128xbf16, #tpu.memory_space<vmem>>, vector<32x128xbf16>
    %cst_82 = arith.constant dense<0.000000e+00> : vector<2x128xf32>
    %238 = tpu.matmul %236, %237, %cst_82 {dimension_numbers = #tpu.dot_dimension_numbers<[1], [0], [0], [1], [0, 0, 1, 1], [], []>} : vector<2x32xbf16>, vector<32x128xbf16>, vector<2x128xf32> -> vector<2x128xf32>
    %239 = arith.addf %235, %238 : vector<2x128xf32>
    %240 = arith.negf %239 : vector<2x128xf32>
    %241 = math.exp %240 : vector<2x128xf32>
    %cst_83 = arith.constant 1.000000e+00 : f32
    %242 = vector.broadcast %cst_83 : f32 to vector<2x128xf32>
    %243 = arith.addf %242, %241 : vector<2x128xf32>
    %244 = arith.divf %242, %243 : vector<2x128xf32>
    %245 = vector.extract_strided_slice %239 {offsets = [0, 64], sizes = [2, 32], strides = [1, 1]} : vector<2x128xf32> to vector<2x32xf32>
    %246 = math.tanh %245 : vector<2x32xf32>
    %247 = vector.extract_strided_slice %244 {offsets = [0, 0], sizes = [2, 32], strides = [1, 1]} : vector<2x128xf32> to vector<2x32xf32>
    %248 = vector.extract_strided_slice %244 {offsets = [0, 32], sizes = [2, 32], strides = [1, 1]} : vector<2x128xf32> to vector<2x32xf32>
    %249 = vector.extract_strided_slice %244 {offsets = [0, 96], sizes = [2, 32], strides = [1, 1]} : vector<2x128xf32> to vector<2x32xf32>
    %250 = arith.mulf %248, %206 : vector<2x32xf32>
    %251 = arith.mulf %247, %246 : vector<2x32xf32>
    %252 = arith.addf %250, %251 : vector<2x32xf32>
    %253 = math.tanh %252 : vector<2x32xf32>
    %254 = arith.mulf %249, %253 : vector<2x32xf32>
    %255 = arith.truncf %233 : vector<2x32xf32> to vector<2x32xbf16>
    %c0_84 = arith.constant 0 : index
    %c0_85 = arith.constant 0 : index
    %256 = vector.load %arg3[%c0_84, %c0_85] : memref<32x128xbf16, #tpu.memory_space<vmem>>, vector<32x128xbf16>
    %cst_86 = arith.constant dense<0.000000e+00> : vector<2x128xf32>
    %257 = tpu.matmul %255, %256, %cst_86 {dimension_numbers = #tpu.dot_dimension_numbers<[1], [0], [0], [1], [0, 0, 1, 1], [], []>} : vector<2x32xbf16>, vector<32x128xbf16>, vector<2x128xf32> -> vector<2x128xf32>
    %258 = arith.truncf %254 : vector<2x32xf32> to vector<2x32xbf16>
    %c0_87 = arith.constant 0 : index
    %c0_88 = arith.constant 0 : index
    %259 = vector.load %arg2[%c0_87, %c0_88] : memref<32x128xbf16, #tpu.memory_space<vmem>>, vector<32x128xbf16>
    %cst_89 = arith.constant dense<0.000000e+00> : vector<2x128xf32>
    %260 = tpu.matmul %258, %259, %cst_89 {dimension_numbers = #tpu.dot_dimension_numbers<[1], [0], [0], [1], [0, 0, 1, 1], [], []>} : vector<2x32xbf16>, vector<32x128xbf16>, vector<2x128xf32> -> vector<2x128xf32>
    %261 = arith.addf %257, %260 : vector<2x128xf32>
    %c0_90 = arith.constant 0 : index
    %c0_91 = arith.constant 0 : index
    %262 = vector.load %arg4[%c0_90, %c0_91] : memref<1x128xf32, #tpu.memory_space<vmem>>, vector<1x128xf32>
    %263 = vector.broadcast %262 : vector<1x128xf32> to vector<2x128xf32>
    %264 = arith.addf %261, %263 : vector<2x128xf32>
    %265 = arith.negf %264 : vector<2x128xf32>
    %266 = math.exp %265 : vector<2x128xf32>
    %cst_92 = arith.constant 1.000000e+00 : f32
    %267 = vector.broadcast %cst_92 : f32 to vector<2x128xf32>
    %268 = arith.addf %267, %266 : vector<2x128xf32>
    %269 = arith.divf %267, %268 : vector<2x128xf32>
    %270 = vector.extract_strided_slice %264 {offsets = [0, 64], sizes = [2, 32], strides = [1, 1]} : vector<2x128xf32> to vector<2x32xf32>
    %271 = math.tanh %270 : vector<2x32xf32>
    %272 = vector.extract_strided_slice %269 {offsets = [0, 0], sizes = [2, 32], strides = [1, 1]} : vector<2x128xf32> to vector<2x32xf32>
    %273 = vector.extract_strided_slice %269 {offsets = [0, 32], sizes = [2, 32], strides = [1, 1]} : vector<2x128xf32> to vector<2x32xf32>
    %274 = vector.extract_strided_slice %269 {offsets = [0, 96], sizes = [2, 32], strides = [1, 1]} : vector<2x128xf32> to vector<2x32xf32>
    %275 = arith.mulf %273, %231 : vector<2x32xf32>
    %276 = arith.mulf %272, %271 : vector<2x32xf32>
    %277 = arith.addf %275, %276 : vector<2x32xf32>
    %278 = math.tanh %277 : vector<2x32xf32>
    %279 = arith.mulf %274, %278 : vector<2x32xf32>
    %c6 = arith.constant 6 : index
    %c0_93 = arith.constant 0 : index
    %c0_94 = arith.constant 0 : index
    %280 = vector.load %arg0[%c6, %c0_93, %c0_94] : memref<8x2x128xf32, #tpu.memory_space<vmem>>, vector<1x2x128xf32>
    %281 = vector.shape_cast %280 : vector<1x2x128xf32> to vector<2x128xf32>
    %282 = arith.truncf %254 : vector<2x32xf32> to vector<2x32xbf16>
    %c0_95 = arith.constant 0 : index
    %c0_96 = arith.constant 0 : index
    %283 = vector.load %arg1[%c0_95, %c0_96] : memref<32x128xbf16, #tpu.memory_space<vmem>>, vector<32x128xbf16>
    %cst_97 = arith.constant dense<0.000000e+00> : vector<2x128xf32>
    %284 = tpu.matmul %282, %283, %cst_97 {dimension_numbers = #tpu.dot_dimension_numbers<[1], [0], [0], [1], [0, 0, 1, 1], [], []>} : vector<2x32xbf16>, vector<32x128xbf16>, vector<2x128xf32> -> vector<2x128xf32>
    %285 = arith.addf %281, %284 : vector<2x128xf32>
    %286 = arith.negf %285 : vector<2x128xf32>
    %287 = math.exp %286 : vector<2x128xf32>
    %cst_98 = arith.constant 1.000000e+00 : f32
    %288 = vector.broadcast %cst_98 : f32 to vector<2x128xf32>
    %289 = arith.addf %288, %287 : vector<2x128xf32>
    %290 = arith.divf %288, %289 : vector<2x128xf32>
    %291 = vector.extract_strided_slice %285 {offsets = [0, 64], sizes = [2, 32], strides = [1, 1]} : vector<2x128xf32> to vector<2x32xf32>
    %292 = math.tanh %291 : vector<2x32xf32>
    %293 = vector.extract_strided_slice %290 {offsets = [0, 0], sizes = [2, 32], strides = [1, 1]} : vector<2x128xf32> to vector<2x32xf32>
    %294 = vector.extract_strided_slice %290 {offsets = [0, 32], sizes = [2, 32], strides = [1, 1]} : vector<2x128xf32> to vector<2x32xf32>
    %295 = vector.extract_strided_slice %290 {offsets = [0, 96], sizes = [2, 32], strides = [1, 1]} : vector<2x128xf32> to vector<2x32xf32>
    %296 = arith.mulf %294, %252 : vector<2x32xf32>
    %297 = arith.mulf %293, %292 : vector<2x32xf32>
    %298 = arith.addf %296, %297 : vector<2x32xf32>
    %299 = math.tanh %298 : vector<2x32xf32>
    %300 = arith.mulf %295, %299 : vector<2x32xf32>
    %301 = arith.truncf %279 : vector<2x32xf32> to vector<2x32xbf16>
    %c0_99 = arith.constant 0 : index
    %c0_100 = arith.constant 0 : index
    %302 = vector.load %arg3[%c0_99, %c0_100] : memref<32x128xbf16, #tpu.memory_space<vmem>>, vector<32x128xbf16>
    %cst_101 = arith.constant dense<0.000000e+00> : vector<2x128xf32>
    %303 = tpu.matmul %301, %302, %cst_101 {dimension_numbers = #tpu.dot_dimension_numbers<[1], [0], [0], [1], [0, 0, 1, 1], [], []>} : vector<2x32xbf16>, vector<32x128xbf16>, vector<2x128xf32> -> vector<2x128xf32>
    %304 = arith.truncf %300 : vector<2x32xf32> to vector<2x32xbf16>
    %c0_102 = arith.constant 0 : index
    %c0_103 = arith.constant 0 : index
    %305 = vector.load %arg2[%c0_102, %c0_103] : memref<32x128xbf16, #tpu.memory_space<vmem>>, vector<32x128xbf16>
    %cst_104 = arith.constant dense<0.000000e+00> : vector<2x128xf32>
    %306 = tpu.matmul %304, %305, %cst_104 {dimension_numbers = #tpu.dot_dimension_numbers<[1], [0], [0], [1], [0, 0, 1, 1], [], []>} : vector<2x32xbf16>, vector<32x128xbf16>, vector<2x128xf32> -> vector<2x128xf32>
    %307 = arith.addf %303, %306 : vector<2x128xf32>
    %c0_105 = arith.constant 0 : index
    %c0_106 = arith.constant 0 : index
    %308 = vector.load %arg4[%c0_105, %c0_106] : memref<1x128xf32, #tpu.memory_space<vmem>>, vector<1x128xf32>
    %309 = vector.broadcast %308 : vector<1x128xf32> to vector<2x128xf32>
    %310 = arith.addf %307, %309 : vector<2x128xf32>
    %311 = arith.negf %310 : vector<2x128xf32>
    %312 = math.exp %311 : vector<2x128xf32>
    %cst_107 = arith.constant 1.000000e+00 : f32
    %313 = vector.broadcast %cst_107 : f32 to vector<2x128xf32>
    %314 = arith.addf %313, %312 : vector<2x128xf32>
    %315 = arith.divf %313, %314 : vector<2x128xf32>
    %316 = vector.extract_strided_slice %310 {offsets = [0, 64], sizes = [2, 32], strides = [1, 1]} : vector<2x128xf32> to vector<2x32xf32>
    %317 = math.tanh %316 : vector<2x32xf32>
    %318 = vector.extract_strided_slice %315 {offsets = [0, 0], sizes = [2, 32], strides = [1, 1]} : vector<2x128xf32> to vector<2x32xf32>
    %319 = vector.extract_strided_slice %315 {offsets = [0, 32], sizes = [2, 32], strides = [1, 1]} : vector<2x128xf32> to vector<2x32xf32>
    %320 = vector.extract_strided_slice %315 {offsets = [0, 96], sizes = [2, 32], strides = [1, 1]} : vector<2x128xf32> to vector<2x32xf32>
    %321 = arith.mulf %319, %277 : vector<2x32xf32>
    %322 = arith.mulf %318, %317 : vector<2x32xf32>
    %323 = arith.addf %321, %322 : vector<2x32xf32>
    %324 = math.tanh %323 : vector<2x32xf32>
    %325 = arith.mulf %320, %324 : vector<2x32xf32>
    %c7 = arith.constant 7 : index
    %c0_108 = arith.constant 0 : index
    %c0_109 = arith.constant 0 : index
    %326 = vector.load %arg0[%c7, %c0_108, %c0_109] : memref<8x2x128xf32, #tpu.memory_space<vmem>>, vector<1x2x128xf32>
    %327 = vector.shape_cast %326 : vector<1x2x128xf32> to vector<2x128xf32>
    %328 = arith.truncf %300 : vector<2x32xf32> to vector<2x32xbf16>
    %c0_110 = arith.constant 0 : index
    %c0_111 = arith.constant 0 : index
    %329 = vector.load %arg1[%c0_110, %c0_111] : memref<32x128xbf16, #tpu.memory_space<vmem>>, vector<32x128xbf16>
    %cst_112 = arith.constant dense<0.000000e+00> : vector<2x128xf32>
    %330 = tpu.matmul %328, %329, %cst_112 {dimension_numbers = #tpu.dot_dimension_numbers<[1], [0], [0], [1], [0, 0, 1, 1], [], []>} : vector<2x32xbf16>, vector<32x128xbf16>, vector<2x128xf32> -> vector<2x128xf32>
    %331 = arith.addf %327, %330 : vector<2x128xf32>
    %332 = arith.negf %331 : vector<2x128xf32>
    %333 = math.exp %332 : vector<2x128xf32>
    %cst_113 = arith.constant 1.000000e+00 : f32
    %334 = vector.broadcast %cst_113 : f32 to vector<2x128xf32>
    %335 = arith.addf %334, %333 : vector<2x128xf32>
    %336 = arith.divf %334, %335 : vector<2x128xf32>
    %337 = vector.extract_strided_slice %331 {offsets = [0, 64], sizes = [2, 32], strides = [1, 1]} : vector<2x128xf32> to vector<2x32xf32>
    %338 = math.tanh %337 : vector<2x32xf32>
    %339 = vector.extract_strided_slice %336 {offsets = [0, 0], sizes = [2, 32], strides = [1, 1]} : vector<2x128xf32> to vector<2x32xf32>
    %340 = vector.extract_strided_slice %336 {offsets = [0, 32], sizes = [2, 32], strides = [1, 1]} : vector<2x128xf32> to vector<2x32xf32>
    %341 = vector.extract_strided_slice %336 {offsets = [0, 96], sizes = [2, 32], strides = [1, 1]} : vector<2x128xf32> to vector<2x32xf32>
    %342 = arith.mulf %340, %298 : vector<2x32xf32>
    %343 = arith.mulf %339, %338 : vector<2x32xf32>
    %344 = arith.addf %342, %343 : vector<2x32xf32>
    %345 = math.tanh %344 : vector<2x32xf32>
    %346 = arith.mulf %341, %345 : vector<2x32xf32>
    %347 = arith.truncf %325 : vector<2x32xf32> to vector<2x32xbf16>
    %c0_114 = arith.constant 0 : index
    %c0_115 = arith.constant 0 : index
    %348 = vector.load %arg3[%c0_114, %c0_115] : memref<32x128xbf16, #tpu.memory_space<vmem>>, vector<32x128xbf16>
    %cst_116 = arith.constant dense<0.000000e+00> : vector<2x128xf32>
    %349 = tpu.matmul %347, %348, %cst_116 {dimension_numbers = #tpu.dot_dimension_numbers<[1], [0], [0], [1], [0, 0, 1, 1], [], []>} : vector<2x32xbf16>, vector<32x128xbf16>, vector<2x128xf32> -> vector<2x128xf32>
    %350 = arith.truncf %346 : vector<2x32xf32> to vector<2x32xbf16>
    %c0_117 = arith.constant 0 : index
    %c0_118 = arith.constant 0 : index
    %351 = vector.load %arg2[%c0_117, %c0_118] : memref<32x128xbf16, #tpu.memory_space<vmem>>, vector<32x128xbf16>
    %cst_119 = arith.constant dense<0.000000e+00> : vector<2x128xf32>
    %352 = tpu.matmul %350, %351, %cst_119 {dimension_numbers = #tpu.dot_dimension_numbers<[1], [0], [0], [1], [0, 0, 1, 1], [], []>} : vector<2x32xbf16>, vector<32x128xbf16>, vector<2x128xf32> -> vector<2x128xf32>
    %353 = arith.addf %349, %352 : vector<2x128xf32>
    %c0_120 = arith.constant 0 : index
    %c0_121 = arith.constant 0 : index
    %354 = vector.load %arg4[%c0_120, %c0_121] : memref<1x128xf32, #tpu.memory_space<vmem>>, vector<1x128xf32>
    %355 = vector.broadcast %354 : vector<1x128xf32> to vector<2x128xf32>
    %356 = arith.addf %353, %355 : vector<2x128xf32>
    %357 = arith.negf %356 : vector<2x128xf32>
    %358 = math.exp %357 : vector<2x128xf32>
    %cst_122 = arith.constant 1.000000e+00 : f32
    %359 = vector.broadcast %cst_122 : f32 to vector<2x128xf32>
    %360 = arith.addf %359, %358 : vector<2x128xf32>
    %361 = arith.divf %359, %360 : vector<2x128xf32>
    %362 = vector.extract_strided_slice %356 {offsets = [0, 64], sizes = [2, 32], strides = [1, 1]} : vector<2x128xf32> to vector<2x32xf32>
    %363 = math.tanh %362 : vector<2x32xf32>
    %364 = vector.extract_strided_slice %361 {offsets = [0, 0], sizes = [2, 32], strides = [1, 1]} : vector<2x128xf32> to vector<2x32xf32>
    %365 = vector.extract_strided_slice %361 {offsets = [0, 32], sizes = [2, 32], strides = [1, 1]} : vector<2x128xf32> to vector<2x32xf32>
    %366 = vector.extract_strided_slice %361 {offsets = [0, 96], sizes = [2, 32], strides = [1, 1]} : vector<2x128xf32> to vector<2x32xf32>
    %367 = arith.mulf %365, %323 : vector<2x32xf32>
    %368 = arith.mulf %364, %363 : vector<2x32xf32>
    %369 = arith.addf %367, %368 : vector<2x32xf32>
    %370 = math.tanh %369 : vector<2x32xf32>
    %371 = arith.mulf %366, %370 : vector<2x32xf32>
    %c0_123 = arith.constant 0 : index
    %c0_124 = arith.constant 0 : index
    %372 = vector.load %arg5[%c0_123, %c0_124] : memref<2x128xf32, #tpu.memory_space<vmem>>, vector<2x128xf32>
    %373 = arith.truncf %346 : vector<2x32xf32> to vector<2x32xbf16>
    %c0_125 = arith.constant 0 : index
    %c0_126 = arith.constant 0 : index
    %374 = vector.load %arg6[%c0_125, %c0_126] : memref<32x128xbf16, #tpu.memory_space<vmem>>, vector<32x128xbf16>
    %cst_127 = arith.constant dense<0.000000e+00> : vector<2x128xf32>
    %375 = tpu.matmul %373, %374, %cst_127 {dimension_numbers = #tpu.dot_dimension_numbers<[1], [0], [0], [1], [0, 0, 1, 1], [], []>} : vector<2x32xbf16>, vector<32x128xbf16>, vector<2x128xf32> -> vector<2x128xf32>
    %376 = arith.addf %372, %375 : vector<2x128xf32>
    %377 = arith.negf %376 : vector<2x128xf32>
    %378 = math.exp %377 : vector<2x128xf32>
    %cst_128 = arith.constant 1.000000e+00 : f32
    %379 = vector.broadcast %cst_128 : f32 to vector<2x128xf32>
    %380 = arith.addf %379, %378 : vector<2x128xf32>
    %381 = arith.divf %379, %380 : vector<2x128xf32>
    %382 = vector.extract_strided_slice %376 {offsets = [0, 64], sizes = [2, 32], strides = [1, 1]} : vector<2x128xf32> to vector<2x32xf32>
    %383 = math.tanh %382 : vector<2x32xf32>
    %384 = vector.extract_strided_slice %381 {offsets = [0, 0], sizes = [2, 32], strides = [1, 1]} : vector<2x128xf32> to vector<2x32xf32>
    %385 = vector.extract_strided_slice %381 {offsets = [0, 32], sizes = [2, 32], strides = [1, 1]} : vector<2x128xf32> to vector<2x32xf32>
    %386 = vector.extract_strided_slice %381 {offsets = [0, 96], sizes = [2, 32], strides = [1, 1]} : vector<2x128xf32> to vector<2x32xf32>
    %387 = arith.mulf %385, %344 : vector<2x32xf32>
    %388 = arith.mulf %384, %383 : vector<2x32xf32>
    %389 = arith.addf %387, %388 : vector<2x32xf32>
    %390 = math.tanh %389 : vector<2x32xf32>
    %391 = arith.mulf %386, %390 : vector<2x32xf32>
    %392 = arith.truncf %371 : vector<2x32xf32> to vector<2x32xbf16>
    %c0_129 = arith.constant 0 : index
    %c0_130 = arith.constant 0 : index
    %393 = vector.load %arg10[%c0_129, %c0_130] : memref<32x128xbf16, #tpu.memory_space<vmem>>, vector<32x128xbf16>
    %cst_131 = arith.constant dense<0.000000e+00> : vector<2x128xf32>
    %394 = tpu.matmul %392, %393, %cst_131 {dimension_numbers = #tpu.dot_dimension_numbers<[1], [0], [0], [1], [0, 0, 1, 1], [], []>} : vector<2x32xbf16>, vector<32x128xbf16>, vector<2x128xf32> -> vector<2x128xf32>
    %395 = arith.truncf %391 : vector<2x32xf32> to vector<2x32xbf16>
    %c0_132 = arith.constant 0 : index
    %c0_133 = arith.constant 0 : index
    %396 = vector.load %arg9[%c0_132, %c0_133] : memref<32x128xbf16, #tpu.memory_space<vmem>>, vector<32x128xbf16>
    %cst_134 = arith.constant dense<0.000000e+00> : vector<2x128xf32>
    %397 = tpu.matmul %395, %396, %cst_134 {dimension_numbers = #tpu.dot_dimension_numbers<[1], [0], [0], [1], [0, 0, 1, 1], [], []>} : vector<2x32xbf16>, vector<32x128xbf16>, vector<2x128xf32> -> vector<2x128xf32>
    %398 = arith.addf %394, %397 : vector<2x128xf32>
    %c0_135 = arith.constant 0 : index
    %c0_136 = arith.constant 0 : index
    %399 = vector.load %arg11[%c0_135, %c0_136] : memref<1x128xf32, #tpu.memory_space<vmem>>, vector<1x128xf32>
    %400 = vector.broadcast %399 : vector<1x128xf32> to vector<2x128xf32>
    %401 = arith.addf %398, %400 : vector<2x128xf32>
    %402 = arith.negf %401 : vector<2x128xf32>
    %403 = math.exp %402 : vector<2x128xf32>
    %cst_137 = arith.constant 1.000000e+00 : f32
    %404 = vector.broadcast %cst_137 : f32 to vector<2x128xf32>
    %405 = arith.addf %404, %403 : vector<2x128xf32>
    %406 = arith.divf %404, %405 : vector<2x128xf32>
    %407 = vector.extract_strided_slice %401 {offsets = [0, 64], sizes = [2, 32], strides = [1, 1]} : vector<2x128xf32> to vector<2x32xf32>
    %408 = math.tanh %407 : vector<2x32xf32>
    %409 = vector.extract_strided_slice %406 {offsets = [0, 0], sizes = [2, 32], strides = [1, 1]} : vector<2x128xf32> to vector<2x32xf32>
    %410 = vector.extract_strided_slice %406 {offsets = [0, 32], sizes = [2, 32], strides = [1, 1]} : vector<2x128xf32> to vector<2x32xf32>
    %411 = vector.extract_strided_slice %406 {offsets = [0, 96], sizes = [2, 32], strides = [1, 1]} : vector<2x128xf32> to vector<2x32xf32>
    %412 = arith.mulf %410, %369 : vector<2x32xf32>
    %413 = arith.mulf %409, %408 : vector<2x32xf32>
    %414 = arith.addf %412, %413 : vector<2x32xf32>
    %415 = math.tanh %414 : vector<2x32xf32>
    %416 = arith.mulf %411, %415 : vector<2x32xf32>
    %417 = arith.truncf %416 : vector<2x32xf32> to vector<2x32xbf16>
    %c0_138 = arith.constant 0 : index
    %c0_139 = arith.constant 0 : index
    %418 = vector.load %arg7[%c0_138, %c0_139] : memref<32x128xbf16, #tpu.memory_space<vmem>>, vector<32x128xbf16>
    %cst_140 = arith.constant dense<0.000000e+00> : vector<2x128xf32>
    %419 = tpu.matmul %417, %418, %cst_140 {dimension_numbers = #tpu.dot_dimension_numbers<[1], [0], [0], [1], [0, 0, 1, 1], [], []>} : vector<2x32xbf16>, vector<32x128xbf16>, vector<2x128xf32> -> vector<2x128xf32>
    %c0_141 = arith.constant 0 : index
    %c0_142 = arith.constant 0 : index
    %420 = vector.load %arg8[%c0_141, %c0_142] : memref<1x128xf32, #tpu.memory_space<vmem>>, vector<1x128xf32>
    %421 = vector.broadcast %420 : vector<1x128xf32> to vector<2x128xf32>
    %422 = arith.addf %419, %421 : vector<2x128xf32>
    %423 = arith.truncf %391 : vector<2x32xf32> to vector<2x32xbf16>
    %c0_143 = arith.constant 0 : index
    %c0_144 = arith.constant 0 : index
    %424 = vector.load %arg6[%c0_143, %c0_144] : memref<32x128xbf16, #tpu.memory_space<vmem>>, vector<32x128xbf16>
    %cst_145 = arith.constant dense<0.000000e+00> : vector<2x128xf32>
    %425 = tpu.matmul %423, %424, %cst_145 {dimension_numbers = #tpu.dot_dimension_numbers<[1], [0], [0], [1], [0, 0, 1, 1], [], []>} : vector<2x32xbf16>, vector<32x128xbf16>, vector<2x128xf32> -> vector<2x128xf32>
    %426 = arith.addf %422, %425 : vector<2x128xf32>
    %427 = arith.negf %426 : vector<2x128xf32>
    %428 = math.exp %427 : vector<2x128xf32>
    %cst_146 = arith.constant 1.000000e+00 : f32
    %429 = vector.broadcast %cst_146 : f32 to vector<2x128xf32>
    %430 = arith.addf %429, %428 : vector<2x128xf32>
    %431 = arith.divf %429, %430 : vector<2x128xf32>
    %432 = vector.extract_strided_slice %426 {offsets = [0, 64], sizes = [2, 32], strides = [1, 1]} : vector<2x128xf32> to vector<2x32xf32>
    %433 = math.tanh %432 : vector<2x32xf32>
    %434 = vector.extract_strided_slice %431 {offsets = [0, 0], sizes = [2, 32], strides = [1, 1]} : vector<2x128xf32> to vector<2x32xf32>
    %435 = vector.extract_strided_slice %431 {offsets = [0, 32], sizes = [2, 32], strides = [1, 1]} : vector<2x128xf32> to vector<2x32xf32>
    %436 = vector.extract_strided_slice %431 {offsets = [0, 96], sizes = [2, 32], strides = [1, 1]} : vector<2x128xf32> to vector<2x32xf32>
    %437 = arith.mulf %435, %389 : vector<2x32xf32>
    %438 = arith.mulf %434, %433 : vector<2x32xf32>
    %439 = arith.addf %437, %438 : vector<2x32xf32>
    %440 = math.tanh %439 : vector<2x32xf32>
    %441 = arith.mulf %436, %440 : vector<2x32xf32>
    %442 = arith.truncf %416 : vector<2x32xf32> to vector<2x32xbf16>
    %c0_147 = arith.constant 0 : index
    %c0_148 = arith.constant 0 : index
    %443 = vector.load %arg10[%c0_147, %c0_148] : memref<32x128xbf16, #tpu.memory_space<vmem>>, vector<32x128xbf16>
    %cst_149 = arith.constant dense<0.000000e+00> : vector<2x128xf32>
    %444 = tpu.matmul %442, %443, %cst_149 {dimension_numbers = #tpu.dot_dimension_numbers<[1], [0], [0], [1], [0, 0, 1, 1], [], []>} : vector<2x32xbf16>, vector<32x128xbf16>, vector<2x128xf32> -> vector<2x128xf32>
    %445 = arith.truncf %441 : vector<2x32xf32> to vector<2x32xbf16>
    %c0_150 = arith.constant 0 : index
    %c0_151 = arith.constant 0 : index
    %446 = vector.load %arg9[%c0_150, %c0_151] : memref<32x128xbf16, #tpu.memory_space<vmem>>, vector<32x128xbf16>
    %cst_152 = arith.constant dense<0.000000e+00> : vector<2x128xf32>
    %447 = tpu.matmul %445, %446, %cst_152 {dimension_numbers = #tpu.dot_dimension_numbers<[1], [0], [0], [1], [0, 0, 1, 1], [], []>} : vector<2x32xbf16>, vector<32x128xbf16>, vector<2x128xf32> -> vector<2x128xf32>
    %448 = arith.addf %444, %447 : vector<2x128xf32>
    %c0_153 = arith.constant 0 : index
    %c0_154 = arith.constant 0 : index
    %449 = vector.load %arg11[%c0_153, %c0_154] : memref<1x128xf32, #tpu.memory_space<vmem>>, vector<1x128xf32>
    %450 = vector.broadcast %449 : vector<1x128xf32> to vector<2x128xf32>
    %451 = arith.addf %448, %450 : vector<2x128xf32>
    %452 = arith.negf %451 : vector<2x128xf32>
    %453 = math.exp %452 : vector<2x128xf32>
    %cst_155 = arith.constant 1.000000e+00 : f32
    %454 = vector.broadcast %cst_155 : f32 to vector<2x128xf32>
    %455 = arith.addf %454, %453 : vector<2x128xf32>
    %456 = arith.divf %454, %455 : vector<2x128xf32>
    %457 = vector.extract_strided_slice %451 {offsets = [0, 64], sizes = [2, 32], strides = [1, 1]} : vector<2x128xf32> to vector<2x32xf32>
    %458 = math.tanh %457 : vector<2x32xf32>
    %459 = vector.extract_strided_slice %456 {offsets = [0, 0], sizes = [2, 32], strides = [1, 1]} : vector<2x128xf32> to vector<2x32xf32>
    %460 = vector.extract_strided_slice %456 {offsets = [0, 32], sizes = [2, 32], strides = [1, 1]} : vector<2x128xf32> to vector<2x32xf32>
    %461 = vector.extract_strided_slice %456 {offsets = [0, 96], sizes = [2, 32], strides = [1, 1]} : vector<2x128xf32> to vector<2x32xf32>
    %462 = arith.mulf %460, %414 : vector<2x32xf32>
    %463 = arith.mulf %459, %458 : vector<2x32xf32>
    %464 = arith.addf %462, %463 : vector<2x32xf32>
    %465 = math.tanh %464 : vector<2x32xf32>
    %466 = arith.mulf %461, %465 : vector<2x32xf32>
    %467 = arith.truncf %466 : vector<2x32xf32> to vector<2x32xbf16>
    %c0_156 = arith.constant 0 : index
    %c0_157 = arith.constant 0 : index
    %468 = vector.load %arg7[%c0_156, %c0_157] : memref<32x128xbf16, #tpu.memory_space<vmem>>, vector<32x128xbf16>
    %cst_158 = arith.constant dense<0.000000e+00> : vector<2x128xf32>
    %469 = tpu.matmul %467, %468, %cst_158 {dimension_numbers = #tpu.dot_dimension_numbers<[1], [0], [0], [1], [0, 0, 1, 1], [], []>} : vector<2x32xbf16>, vector<32x128xbf16>, vector<2x128xf32> -> vector<2x128xf32>
    %c0_159 = arith.constant 0 : index
    %c0_160 = arith.constant 0 : index
    %470 = vector.load %arg8[%c0_159, %c0_160] : memref<1x128xf32, #tpu.memory_space<vmem>>, vector<1x128xf32>
    %471 = vector.broadcast %470 : vector<1x128xf32> to vector<2x128xf32>
    %472 = arith.addf %469, %471 : vector<2x128xf32>
    %473 = arith.truncf %441 : vector<2x32xf32> to vector<2x32xbf16>
    %c0_161 = arith.constant 0 : index
    %c0_162 = arith.constant 0 : index
    %474 = vector.load %arg6[%c0_161, %c0_162] : memref<32x128xbf16, #tpu.memory_space<vmem>>, vector<32x128xbf16>
    %cst_163 = arith.constant dense<0.000000e+00> : vector<2x128xf32>
    %475 = tpu.matmul %473, %474, %cst_163 {dimension_numbers = #tpu.dot_dimension_numbers<[1], [0], [0], [1], [0, 0, 1, 1], [], []>} : vector<2x32xbf16>, vector<32x128xbf16>, vector<2x128xf32> -> vector<2x128xf32>
    %476 = arith.addf %472, %475 : vector<2x128xf32>
    %477 = arith.negf %476 : vector<2x128xf32>
    %478 = math.exp %477 : vector<2x128xf32>
    %cst_164 = arith.constant 1.000000e+00 : f32
    %479 = vector.broadcast %cst_164 : f32 to vector<2x128xf32>
    %480 = arith.addf %479, %478 : vector<2x128xf32>
    %481 = arith.divf %479, %480 : vector<2x128xf32>
    %482 = vector.extract_strided_slice %476 {offsets = [0, 64], sizes = [2, 32], strides = [1, 1]} : vector<2x128xf32> to vector<2x32xf32>
    %483 = math.tanh %482 : vector<2x32xf32>
    %484 = vector.extract_strided_slice %481 {offsets = [0, 0], sizes = [2, 32], strides = [1, 1]} : vector<2x128xf32> to vector<2x32xf32>
    %485 = vector.extract_strided_slice %481 {offsets = [0, 32], sizes = [2, 32], strides = [1, 1]} : vector<2x128xf32> to vector<2x32xf32>
    %486 = vector.extract_strided_slice %481 {offsets = [0, 96], sizes = [2, 32], strides = [1, 1]} : vector<2x128xf32> to vector<2x32xf32>
    %487 = arith.mulf %485, %439 : vector<2x32xf32>
    %488 = arith.mulf %484, %483 : vector<2x32xf32>
    %489 = arith.addf %487, %488 : vector<2x32xf32>
    %490 = math.tanh %489 : vector<2x32xf32>
    %491 = arith.mulf %486, %490 : vector<2x32xf32>
    %492 = arith.truncf %466 : vector<2x32xf32> to vector<2x32xbf16>
    %c0_165 = arith.constant 0 : index
    %c0_166 = arith.constant 0 : index
    %493 = vector.load %arg10[%c0_165, %c0_166] : memref<32x128xbf16, #tpu.memory_space<vmem>>, vector<32x128xbf16>
    %cst_167 = arith.constant dense<0.000000e+00> : vector<2x128xf32>
    %494 = tpu.matmul %492, %493, %cst_167 {dimension_numbers = #tpu.dot_dimension_numbers<[1], [0], [0], [1], [0, 0, 1, 1], [], []>} : vector<2x32xbf16>, vector<32x128xbf16>, vector<2x128xf32> -> vector<2x128xf32>
    %495 = arith.truncf %491 : vector<2x32xf32> to vector<2x32xbf16>
    %c0_168 = arith.constant 0 : index
    %c0_169 = arith.constant 0 : index
    %496 = vector.load %arg9[%c0_168, %c0_169] : memref<32x128xbf16, #tpu.memory_space<vmem>>, vector<32x128xbf16>
    %cst_170 = arith.constant dense<0.000000e+00> : vector<2x128xf32>
    %497 = tpu.matmul %495, %496, %cst_170 {dimension_numbers = #tpu.dot_dimension_numbers<[1], [0], [0], [1], [0, 0, 1, 1], [], []>} : vector<2x32xbf16>, vector<32x128xbf16>, vector<2x128xf32> -> vector<2x128xf32>
    %498 = arith.addf %494, %497 : vector<2x128xf32>
    %c0_171 = arith.constant 0 : index
    %c0_172 = arith.constant 0 : index
    %499 = vector.load %arg11[%c0_171, %c0_172] : memref<1x128xf32, #tpu.memory_space<vmem>>, vector<1x128xf32>
    %500 = vector.broadcast %499 : vector<1x128xf32> to vector<2x128xf32>
    %501 = arith.addf %498, %500 : vector<2x128xf32>
    %502 = arith.negf %501 : vector<2x128xf32>
    %503 = math.exp %502 : vector<2x128xf32>
    %cst_173 = arith.constant 1.000000e+00 : f32
    %504 = vector.broadcast %cst_173 : f32 to vector<2x128xf32>
    %505 = arith.addf %504, %503 : vector<2x128xf32>
    %506 = arith.divf %504, %505 : vector<2x128xf32>
    %507 = vector.extract_strided_slice %501 {offsets = [0, 64], sizes = [2, 32], strides = [1, 1]} : vector<2x128xf32> to vector<2x32xf32>
    %508 = math.tanh %507 : vector<2x32xf32>
    %509 = vector.extract_strided_slice %506 {offsets = [0, 0], sizes = [2, 32], strides = [1, 1]} : vector<2x128xf32> to vector<2x32xf32>
    %510 = vector.extract_strided_slice %506 {offsets = [0, 32], sizes = [2, 32], strides = [1, 1]} : vector<2x128xf32> to vector<2x32xf32>
    %511 = vector.extract_strided_slice %506 {offsets = [0, 96], sizes = [2, 32], strides = [1, 1]} : vector<2x128xf32> to vector<2x32xf32>
    %512 = arith.mulf %510, %464 : vector<2x32xf32>
    %513 = arith.mulf %509, %508 : vector<2x32xf32>
    %514 = arith.addf %512, %513 : vector<2x32xf32>
    %515 = math.tanh %514 : vector<2x32xf32>
    %516 = arith.mulf %511, %515 : vector<2x32xf32>
    %517 = arith.truncf %516 : vector<2x32xf32> to vector<2x32xbf16>
    %c0_174 = arith.constant 0 : index
    %c0_175 = arith.constant 0 : index
    %518 = vector.load %arg7[%c0_174, %c0_175] : memref<32x128xbf16, #tpu.memory_space<vmem>>, vector<32x128xbf16>
    %cst_176 = arith.constant dense<0.000000e+00> : vector<2x128xf32>
    %519 = tpu.matmul %517, %518, %cst_176 {dimension_numbers = #tpu.dot_dimension_numbers<[1], [0], [0], [1], [0, 0, 1, 1], [], []>} : vector<2x32xbf16>, vector<32x128xbf16>, vector<2x128xf32> -> vector<2x128xf32>
    %c0_177 = arith.constant 0 : index
    %c0_178 = arith.constant 0 : index
    %520 = vector.load %arg8[%c0_177, %c0_178] : memref<1x128xf32, #tpu.memory_space<vmem>>, vector<1x128xf32>
    %521 = vector.broadcast %520 : vector<1x128xf32> to vector<2x128xf32>
    %522 = arith.addf %519, %521 : vector<2x128xf32>
    %523 = arith.truncf %491 : vector<2x32xf32> to vector<2x32xbf16>
    %c0_179 = arith.constant 0 : index
    %c0_180 = arith.constant 0 : index
    %524 = vector.load %arg6[%c0_179, %c0_180] : memref<32x128xbf16, #tpu.memory_space<vmem>>, vector<32x128xbf16>
    %cst_181 = arith.constant dense<0.000000e+00> : vector<2x128xf32>
    %525 = tpu.matmul %523, %524, %cst_181 {dimension_numbers = #tpu.dot_dimension_numbers<[1], [0], [0], [1], [0, 0, 1, 1], [], []>} : vector<2x32xbf16>, vector<32x128xbf16>, vector<2x128xf32> -> vector<2x128xf32>
    %526 = arith.addf %522, %525 : vector<2x128xf32>
    %527 = arith.negf %526 : vector<2x128xf32>
    %528 = math.exp %527 : vector<2x128xf32>
    %cst_182 = arith.constant 1.000000e+00 : f32
    %529 = vector.broadcast %cst_182 : f32 to vector<2x128xf32>
    %530 = arith.addf %529, %528 : vector<2x128xf32>
    %531 = arith.divf %529, %530 : vector<2x128xf32>
    %532 = vector.extract_strided_slice %526 {offsets = [0, 64], sizes = [2, 32], strides = [1, 1]} : vector<2x128xf32> to vector<2x32xf32>
    %533 = math.tanh %532 : vector<2x32xf32>
    %534 = vector.extract_strided_slice %531 {offsets = [0, 0], sizes = [2, 32], strides = [1, 1]} : vector<2x128xf32> to vector<2x32xf32>
    %535 = vector.extract_strided_slice %531 {offsets = [0, 32], sizes = [2, 32], strides = [1, 1]} : vector<2x128xf32> to vector<2x32xf32>
    %536 = vector.extract_strided_slice %531 {offsets = [0, 96], sizes = [2, 32], strides = [1, 1]} : vector<2x128xf32> to vector<2x32xf32>
    %537 = arith.mulf %535, %489 : vector<2x32xf32>
    %538 = arith.mulf %534, %533 : vector<2x32xf32>
    %539 = arith.addf %537, %538 : vector<2x32xf32>
    %540 = math.tanh %539 : vector<2x32xf32>
    %541 = arith.mulf %536, %540 : vector<2x32xf32>
    %542 = arith.truncf %516 : vector<2x32xf32> to vector<2x32xbf16>
    %c0_183 = arith.constant 0 : index
    %c0_184 = arith.constant 0 : index
    %543 = vector.load %arg10[%c0_183, %c0_184] : memref<32x128xbf16, #tpu.memory_space<vmem>>, vector<32x128xbf16>
    %cst_185 = arith.constant dense<0.000000e+00> : vector<2x128xf32>
    %544 = tpu.matmul %542, %543, %cst_185 {dimension_numbers = #tpu.dot_dimension_numbers<[1], [0], [0], [1], [0, 0, 1, 1], [], []>} : vector<2x32xbf16>, vector<32x128xbf16>, vector<2x128xf32> -> vector<2x128xf32>
    %545 = arith.truncf %541 : vector<2x32xf32> to vector<2x32xbf16>
    %c0_186 = arith.constant 0 : index
    %c0_187 = arith.constant 0 : index
    %546 = vector.load %arg9[%c0_186, %c0_187] : memref<32x128xbf16, #tpu.memory_space<vmem>>, vector<32x128xbf16>
    %cst_188 = arith.constant dense<0.000000e+00> : vector<2x128xf32>
    %547 = tpu.matmul %545, %546, %cst_188 {dimension_numbers = #tpu.dot_dimension_numbers<[1], [0], [0], [1], [0, 0, 1, 1], [], []>} : vector<2x32xbf16>, vector<32x128xbf16>, vector<2x128xf32> -> vector<2x128xf32>
    %548 = arith.addf %544, %547 : vector<2x128xf32>
    %c0_189 = arith.constant 0 : index
    %c0_190 = arith.constant 0 : index
    %549 = vector.load %arg11[%c0_189, %c0_190] : memref<1x128xf32, #tpu.memory_space<vmem>>, vector<1x128xf32>
    %550 = vector.broadcast %549 : vector<1x128xf32> to vector<2x128xf32>
    %551 = arith.addf %548, %550 : vector<2x128xf32>
    %552 = arith.negf %551 : vector<2x128xf32>
    %553 = math.exp %552 : vector<2x128xf32>
    %cst_191 = arith.constant 1.000000e+00 : f32
    %554 = vector.broadcast %cst_191 : f32 to vector<2x128xf32>
    %555 = arith.addf %554, %553 : vector<2x128xf32>
    %556 = arith.divf %554, %555 : vector<2x128xf32>
    %557 = vector.extract_strided_slice %551 {offsets = [0, 64], sizes = [2, 32], strides = [1, 1]} : vector<2x128xf32> to vector<2x32xf32>
    %558 = math.tanh %557 : vector<2x32xf32>
    %559 = vector.extract_strided_slice %556 {offsets = [0, 0], sizes = [2, 32], strides = [1, 1]} : vector<2x128xf32> to vector<2x32xf32>
    %560 = vector.extract_strided_slice %556 {offsets = [0, 32], sizes = [2, 32], strides = [1, 1]} : vector<2x128xf32> to vector<2x32xf32>
    %561 = vector.extract_strided_slice %556 {offsets = [0, 96], sizes = [2, 32], strides = [1, 1]} : vector<2x128xf32> to vector<2x32xf32>
    %562 = arith.mulf %560, %514 : vector<2x32xf32>
    %563 = arith.mulf %559, %558 : vector<2x32xf32>
    %564 = arith.addf %562, %563 : vector<2x32xf32>
    %565 = math.tanh %564 : vector<2x32xf32>
    %566 = arith.mulf %561, %565 : vector<2x32xf32>
    %567 = tpu.concatenate %416, %466, %516, %566 in 0 : vector<2x32xf32>, vector<2x32xf32>, vector<2x32xf32>, vector<2x32xf32> -> vector<8x32xf32>
    %c0_192 = arith.constant 0 : index
    %c0_193 = arith.constant 0 : index
    %568 = vector.load %arg12[%c0_192, %c0_193] : memref<32x2xf32, #tpu.memory_space<vmem>>, vector<32x2xf32>
    %cst_194 = arith.constant dense<0.000000e+00> : vector<8x2xf32>
    %569 = tpu.matmul %567, %568, %cst_194 {dimension_numbers = #tpu.dot_dimension_numbers<[1], [0], [0], [1], [0, 0, 1, 1], [], []>} : vector<8x32xf32>, vector<32x2xf32>, vector<8x2xf32> -> vector<8x2xf32>
    %c0_195 = arith.constant 0 : index
    %c0_196 = arith.constant 0 : index
    %570 = vector.load %arg13[%c0_195, %c0_196] : memref<1x2xf32, #tpu.memory_space<vmem>>, vector<1x2xf32>
    %571 = vector.broadcast %570 : vector<1x2xf32> to vector<8x2xf32>
    %572 = arith.addf %569, %571 : vector<8x2xf32>
    %c0_197 = arith.constant 0 : index
    %c0_198 = arith.constant 0 : index
    %573 = vector.load %arg14[%c0_197, %c0_198] : memref<8x2xf32, #tpu.memory_space<vmem>>, vector<8x2xf32>
    tpu.vector_store %arg14[%c0_197, %c0_198], %572 {strides = array<i32>} : memref<8x2xf32, #tpu.memory_space<vmem>>, vector<8x2xf32>,
    return
  }
}

</mosaic_0001>

<bundles_post_ra>
// kernel: tpu_custom_call.1
= control target key start
LH: loop header
LB: loop body
LE: loop exit
PB: predicated region body
PF: predicated region fallthrough
CT: control target
= control target key end

     0   :  { %19 = vsyncpa [#allocation3], 0  ;;  %s4445_s0 = inlined_call_operand.vmem [shape: f32[8,2,128], index: 0, kind: input, shape index: {}]   ;;  %s4446_s1 = inlined_call_operand.vmem [shape: bf16[32,128], index: 1, kind: input, shape index: {}]   ;;  %s4447_s2 = inlined_call_operand.hbm [shape: bf16[32,128], index: 2, kind: input, shape index: {}]   ;;  %s4448_s3 = inlined_call_operand.hbm [shape: bf16[32,128], index: 3, kind: input, shape index: {}]   ;;  %s4449_s4 = inlined_call_operand.hbm [shape: f32[1,128], index: 4, kind: input, shape index: {}]   ;;  %s4450_s5 = inlined_call_operand.hbm [shape: f32[2,128], index: 5, kind: input, shape index: {}]   ;;  %s4451_s6 = inlined_call_operand.vmem [shape: bf16[32,128], index: 6, kind: input, shape index: {}]   ;;  %s4452_s7 = inlined_call_operand.hbm [shape: bf16[32,128], index: 7, kind: input, shape index: {}]   ;;  %s4453_s8 = inlined_call_operand.hbm [shape: f32[1,128], index: 8, kind: input, shape index: {}]   ;;  %s4454_s9 = inlined_call_operand.vmem [shape: bf16[32,128], index: 9, kind: input, shape index: {}]   ;;  %s4455_s10 = inlined_call_operand.hbm [shape: bf16[32,128], index: 10, kind: input, shape index: {}]   ;;  %s4456_s11 = inlined_call_operand.vmem [shape: f32[1,128], index: 11, kind: input, shape index: {}]   ;;  %s4457_s12 = inlined_call_operand.vmem [shape: f32[32,2], index: 12, kind: input, shape index: {}]   ;;  %s4458_s13 = inlined_call_operand.vmem [shape: f32[1,2], index: 13, kind: input, shape index: {}]   ;;  %s4459_s14 = inlined_call_operand.vmem [shape: f32[8,2], index: 14, kind: output, shape index: {}]  }
   0x1   :  { %20 = vsyncpa [#allocation5], 0 }
   0x2   :  { %21 = vsyncpa [#allocation8], 0 }
   0x3   :  { %22 = vsyncpa [#allocation11], 0  ;;  %s3662_s29 = smov [#allocation4]   ;;  %s3663_s15 = smov [#allocation7]  }
   0x4   :  { %s44_s30 = sshll.u32 %s3662_s29, 4  ;;  %s67_s16 = sshll.u32 %s3663_s15, 4  ;;  %s45_s30 = int_to_ptr.vmem [resolvable:$true] %s44_s30  ;;  %s68_s16 = int_to_ptr.vmem [resolvable:$true] %s67_s16 }
   0x5   :  { %s3500_s19 = scalar_lea.hbm %s4448_s3, 256 }
   0x6   :  { %p3501_p0 = scmp.ne.s32.totalorder %s4448_s3, %s3500_s19  ;;  %p3504_p1 = scmp.lt.u32.totalorder %s3500_s19, %s4448_s3 }
   0x8   :  { %p3506_p2 = pnand %p3504_p1, %p3501_p0 }
   0xa   :  { %3509 = shalt.err (!%p3506_p2)
}
   0xb   :  { %s3510_s24 = scalar_lea.vmem %s45_s30, 256  ;;  %p3515_p4 = scmp.lt.s32.totalorder %s45_s30, %s45_s30 }
   0xc   :  { %p3511_p3 = scmp.ne.s32.totalorder %s45_s30, %s3510_s24  ;;  %p3516_p5 = scmp.lt.s32.totalorder %s3510_s24, %s3510_s24 }
   0xe   :  { %p3517_p6 = por %p3516_p5, %p3515_p4 }
  0x10   :  { %p3518_p7 = pnand %p3517_p6, %p3511_p3 }
  0x12   :  { %3521 = shalt.err (!%p3518_p7)
}
  0x13   :  { %s3664_s25 = smov 64   ;;  %s3665_s26 = smov 4  }
  0x14   :  { %50 = dma.hbm_to_vmem [thread:$0]  %s4448_s3, 256, %s45_s30, [#allocation5], %s3664_s25, %s3664_s25, %s3665_s26  }
  0x15   :  { %s3522_s17 = scalar_lea.hbm %s4450_s5, 32 }
  0x16   :  { %p3523_p8 = scmp.ne.s32.totalorder %s4450_s5, %s3522_s17  ;;  %p3526_p9 = scmp.lt.u32.totalorder %s3522_s17, %s4450_s5 }
  0x18   :  { %p3528_p10 = pnand %p3526_p9, %p3523_p8 }
  0x1a   :  { %3531 = shalt.err (!%p3528_p10)
}
  0x1b   :  { %s3532_s22 = scalar_lea.vmem %s68_s16, 32  ;;  %p3537_p12 = scmp.lt.s32.totalorder %s68_s16, %s68_s16 }
  0x1c   :  { %p3533_p11 = scmp.ne.s32.totalorder %s68_s16, %s3532_s22  ;;  %p3538_p13 = scmp.lt.s32.totalorder %s3532_s22, %s3532_s22 }
  0x1e   :  { %p3539_p0 = por %p3538_p13, %p3537_p12 }
  0x20   :  { %p3540_p1 = pnand %p3539_p0, %p3533_p11 }
  0x22   :  { %3543 = shalt.err (!%p3540_p1)
}
  0x23   :  { %70 = dma.hbm_to_vmem [thread:$0]  %s4450_s5, 32, %s68_s16, [#allocation8]  }
  0x24   :  { %s3666_s23 = smov [#allocation10]   ;;  %s3667_s27 = smov [#allocation2]  }
  0x25   :  { %s91_s24 = sshll.u32 %s3666_s23, 4  ;;  %s32_s28 = sshll.u32 %s3667_s27, 4  ;;  %s92_s24 = int_to_ptr.vmem [resolvable:$true] %s91_s24  ;;  %s3778_s28 = int_to_ptr.vmem [resolvable:$true] %s32_s28 }
  0x26   :  { %s3544_s17 = scalar_lea.hbm %s4453_s8, 16 }
  0x27   :  { %p3545_p2 = scmp.ne.s32.totalorder %s4453_s8, %s3544_s17  ;;  %p3548_p3 = scmp.lt.u32.totalorder %s3544_s17, %s4453_s8 }
  0x29   :  { %p3550_p4 = pnand %p3548_p3, %p3545_p2 }
  0x2b   :  { %3553 = shalt.err (!%p3550_p4)
}
  0x2c   :  { %s3554_s5 = scalar_lea.vmem %s92_s24, 16  ;;  %s3558_s16 = scalar_lea.vmem %s92_s24, 32 }
  0x2d   :  { %p3555_p5 = scmp.ne.s32.totalorder %s92_s24, %s3554_s5  ;;  %p3559_p6 = scmp.lt.s32.totalorder %s92_s24, %s92_s24 }
  0x2e   :  { %p3560_p7 = scmp.lt.s32.totalorder %s3558_s16, %s3554_s5 }
  0x30   :  { %p3561_p8 = por %p3560_p7, %p3559_p6 }
  0x32   :  { %p3562_p9 = pnand %p3561_p8, %p3555_p5 }
  0x34   :  { %3565 = shalt.err (!%p3562_p9)
}
  0x35   :  { %94 = dma.hbm_to_vmem [thread:$0]  %s4453_s8, 16, %s92_s24, [#allocation11]  }
  0x36   :  { %s3566_s27 = scalar_lea.hbm %s4447_s2, 256 }
  0x37   :  { %p3567_p10 = scmp.ne.s32.totalorder %s4447_s2, %s3566_s27  ;;  %p3570_p11 = scmp.lt.u32.totalorder %s3566_s27, %s4447_s2 }
  0x39   :  { %p3572_p12 = pnand %p3570_p11, %p3567_p10 }
  0x3b   :  { %3575 = shalt.err (!%p3572_p12)
}
  0x3c   :  { %s3576_s19 = scalar_lea.vmem %s3778_s28, 256  ;;  %p3581_p0 = scmp.lt.s32.totalorder %s3778_s28, %s3778_s28 }
  0x3d   :  { %p3577_p13 = scmp.ne.s32.totalorder %s3778_s28, %s3576_s19  ;;  %p3582_p1 = scmp.lt.s32.totalorder %s3576_s19, %s3576_s19 }
  0x3f   :  { %p3583_p2 = por %p3582_p1, %p3581_p0 }
  0x41   :  { %p3584_p3 = pnand %p3583_p2, %p3577_p13 }
  0x43   :  { %3587 = shalt.err (!%p3584_p3)
}
  0x44   :  { %38 = dma.hbm_to_vmem [thread:$0]  %s4447_s2, 256, %s3778_s28, [#allocation3], %s3664_s25, %s3664_s25, %s3665_s26  }
  0x45   :  { %s3668_s20 = smov [#allocation6]   ;;  %s3669_s5 = smov [#allocation9]  }
  0x46   :  { %s57_s21 = sshll.u32 %s3668_s20, 4  ;;  %s78_s16 = sshll.u32 %s3669_s5, 4  ;;  %s58_s21 = int_to_ptr.vmem [resolvable:$true] %s57_s21  ;;  %s3812_s16 = int_to_ptr.vmem [resolvable:$true] %s78_s16 }
  0x47   :  { %s3588_s30 = scalar_lea.hbm %s4449_s4, 16 }
  0x48   :  { %p3589_p4 = scmp.ne.s32.totalorder %s4449_s4, %s3588_s30  ;;  %p3592_p5 = scmp.lt.u32.totalorder %s3588_s30, %s4449_s4 }
  0x4a   :  { %p3594_p6 = pnand %p3592_p5, %p3589_p4 }
  0x4c   :  { %3597 = shalt.err (!%p3594_p6)
}
  0x4d   :  { %s3598_s2 = scalar_lea.vmem %s58_s21, 16  ;;  %s3602_s28 = scalar_lea.vmem %s58_s21, 32 }
  0x4e   :  { %p3599_p7 = scmp.ne.s32.totalorder %s58_s21, %s3598_s2  ;;  %p3603_p8 = scmp.lt.s32.totalorder %s58_s21, %s58_s21 }
  0x4f   :  { %p3604_p9 = scmp.lt.s32.totalorder %s3602_s28, %s3598_s2 }
  0x51   :  { %p3605_p10 = por %p3604_p9, %p3603_p8 }
  0x53   :  { %p3606_p11 = pnand %p3605_p10, %p3599_p7 }
  0x55   :  { %3609 = shalt.err (!%p3606_p11)
}
  0x56   :  { %60 = dma.hbm_to_vmem [thread:$0]  %s4449_s4, 16, %s58_s21, [#allocation5]  }
  0x57   :  { %s3610_s24 = scalar_lea.hbm %s4452_s7, 256 }
  0x58   :  { %p3611_p12 = scmp.ne.s32.totalorder %s4452_s7, %s3610_s24  ;;  %p3614_p13 = scmp.lt.u32.totalorder %s3610_s24, %s4452_s7 }
  0x5a   :  { %p3616_p0 = pnand %p3614_p13, %p3611_p12 }
  0x5c   :  { %3619 = shalt.err (!%p3616_p0)
}
  0x5d   :  { %s3620_s30 = scalar_lea.vmem %s3812_s16, 256  ;;  %p3625_p2 = scmp.lt.s32.totalorder %s3812_s16, %s3812_s16 }
  0x5e   :  { %p3621_p1 = scmp.ne.s32.totalorder %s3812_s16, %s3620_s30  ;;  %p3626_p3 = scmp.lt.s32.totalorder %s3620_s30, %s3620_s30 }
  0x60   :  { %p3627_p4 = por %p3626_p3, %p3625_p2 }
  0x62   :  { %p3628_p5 = pnand %p3627_p4, %p3621_p1 }
  0x64   :  { %3631 = shalt.err (!%p3628_p5)
}
  0x65   :  { %84 = dma.hbm_to_vmem [thread:$0]  %s4452_s7, 256, %s3812_s16, [#allocation8], %s3664_s25, %s3664_s25, %s3665_s26  }
  0x66   :  { %s3670_s23 = smov [#allocation12]   ;;  %s3632_s2 = scalar_lea.hbm %s4455_s10, 256 }
  0x67   :  { %s102_s27 = sshll.u32 %s3670_s23, 4  ;;  %p3633_p6 = scmp.ne.s32.totalorder %s4455_s10, %s3632_s2  ;;  %s103_s27 = int_to_ptr.vmem [resolvable:$true] %s102_s27 }
  0x68   :  { %p3636_p7 = scmp.lt.u32.totalorder %s3632_s2, %s4455_s10 }
  0x6a   :  { %p3638_p8 = pnand %p3636_p7, %p3633_p6 }
  0x6c   :  { %3641 = shalt.err (!%p3638_p8)
}
  0x6d   :  { %s3642_s8 = scalar_lea.vmem %s103_s27, 256  ;;  %p3647_p10 = scmp.lt.s32.totalorder %s103_s27, %s103_s27 }
  0x6e   :  { %p3643_p9 = scmp.ne.s32.totalorder %s103_s27, %s3642_s8  ;;  %p3648_p11 = scmp.lt.s32.totalorder %s3642_s8, %s3642_s8 }
  0x70   :  { %p3649_p12 = por %p3648_p11, %p3647_p10 }
  0x72   :  { %p3650_p13 = pnand %p3649_p12, %p3643_p9 }
  0x74   :  { %3653 = shalt.err (!%p3650_p13)
}
  0x75   :  { %108 = dma.hbm_to_vmem [thread:$0]  %s4455_s10, 256, %s103_s27, [#allocation11], %s3664_s25, %s3664_s25, %s3665_s26  }
  0x76   :  { %3654 = dma.done.wait [#allocation3], 256  }
  0x77   :  { %3655 = vsyncadd [#allocation3], 4294967040 }
  0x78   :  { %3656 = dma.done.wait [#allocation5], 272  }
  0x79   :  { %3657 = vsyncadd [#allocation5], 4294967024 }
  0x7a   :  { %3658 = dma.done.wait [#allocation8], 288  }
  0x7b   :  { %3659 = vsyncadd [#allocation8], 4294967008 }
  0x7c   :  { %3660 = dma.done.wait [#allocation11], 272  }
  0x7d   :  { %3661 = vsyncadd [#allocation11], 4294967024  ;;  %v3671_v0 = vmov 0.0   ;;  %vm3672_vm0 = vmmov 0   ;;  %v3870_v1 = vld [vmem:[%s4446_s1] sm:$0xff]   ;;  %v3876_v2 = vld [vmem:[%s4446_s1 + $0x8] sm:$0xff]  }
  0x7e   :  { %2931 = vmatprep.subr.bf16.mxu0 %v3671_v0  ;;  %2935 = vmatprep.mubr.msk.bf16.mxu0 %vm3672_vm0, %v3671_v0  ;;  %v3673_v3 = vmov 0   ;;  %v137_v4 = vld [vmem:[%s4445_s0] sm:$0x3]  ;;  %s3674_s3 = smov 32   ;;  %v3893_v21 = vld [vmem:[#allocation4] sm:$0xff]   ;;  %v3897_v22 = vld [vmem:[#allocation2 + $0x8] sm:$0xff]  }
  0x7f   :  { %2939 = vmatprep.subr.bf16.mxu1 %v3671_v0  ;;  %2943 = vmatprep.mubr.msk.bf16.mxu1 %vm3672_vm0, %v3671_v0  ;;  %v3891_v20 = vld [vmem:[#allocation2] sm:$0xff]   ;;  %v3899_v23 = vld [vmem:[#allocation4 + $0x8] sm:$0xff]   ;;  %vm154_vm1 = vcmask 261120   ;;  %vm2620_vm2 = vcmask 1041408   ;;  %vm2622_vm3 = vcmask 1043456   ;;  %vm2624_vm4 = vcmask 1045504  }
  0x80   :  { %2932 = vmatpush3.bf16.msra.mxu0 %v3870_v1  ;;  %2940 = vmatpush3.bf16.msra.mxu1 %v3891_v20  ;;  %v3929_v34 = vld [vmem:[#allocation6] ss:$0 sm:$0xff]  ;;  %v2732_v40 = vld [vmem:[%s4445_s0 + $0x2] sm:$0x3]  ;;  %vm2712_vm5 = vcmask 15360  }
  0x81   :  { %2933 = vmatprep.subr.bf16.mxu0 %v3671_v0  ;;  %2941 = vmatprep.subr.bf16.mxu1 %v3671_v0 }
  0x84   :  { %2934 = vmatpush3.bf16.msra.mxu0 %v3876_v2  ;;  %2942 = vmatpush3.bf16.msra.mxu1 %v3897_v22 }
  0x85   :  { %2947 = vmatprep.subr.bf16.mxu0 %v3671_v0  ;;  %2955 = vmatprep.subr.bf16.mxu1 %v3671_v0 }
  0x87   :  { %2936 = vmatmul.mubr.bf16.vlgmr.msra.gmra.mrb[0].mxu0 %v3673_v3 }
  0x88   :  { %2951 = vmatprep.mubr.msk.bf16.mxu0 %vm3672_vm0, %v3671_v0  ;;  %2948 = vmatpush3.bf16.msra.mxu0 %v3893_v21 }
  0x89   :  { %2949 = vmatprep.subr.bf16.mxu0 %v3671_v0 }
  0x8c   :  { %2950 = vmatpush3.bf16.msra.mxu0 %v3899_v23 }
  0x8d   :  { %2963 = vmatprep.subr.bf16.mxu0 %v3671_v0 }
  0x8f   :  { %2952 = vmatmul.mubr.bf16.vlgmr.msra.gmra.mrb[4].mxu0 %v3673_v3 }
  0x90   :  { %2964 = vmatpush3.bf16.msra.mxu0 %v3891_v20  ;;  %2967 = vmatprep.mubr.msk.bf16.mxu0 %vm3672_vm0, %v3671_v0 }
  0x91   :  { %2965 = vmatprep.subr.bf16.mxu0 %v3671_v0 }
  0x94   :  { %2966 = vmatpush3.bf16.msra.mxu0 %v3897_v22 }
  0x95   :  { %2979 = vmatprep.subr.bf16.mxu0 %v3671_v0 }
 0x15a   :  { %v192_v5 = vpop.f32.mrb[0].mxu0 }
 0x15b   :  { %v198_v6 = vadd.f32 %v192_v5, %v137_v4  ;;  %v2937_v7 = vpop.f32.mrb[1].mxu0 }
 0x15c   :  { %v195_v8 = vpop.f32.mrb[2].mxu0 }
 0x15d   :  { %v2938_v9 = vpop.f32.mrb[3].mxu0  ;;  %3303 = vtanh.f32 %v198_v6  ;;  %v2724_v11 = vmul.f32 -1.442695, %v198_v6 }
 0x15f   :  { %3305 = vpow2.f32 %v2724_v11 }
 0x162   :  { %v336_v29 = vpop.f32.mrb[4].mxu0 }
 0x163   :  { %v2953_v30 = vpop.f32.mrb[5].mxu0 }
 0x164   :  { %v339_v31 = vpop.f32.mrb[6].mxu0 }
 0x165   :  { %v2954_v32 = vpop.f32.mrb[7].mxu0 }
 0x167   :  { %v3304_v10 = vpop.eup %3303 }
 0x168   :  { %208 = vrot.lane.b32.xlu0 %v3304_v10, %s3664_s25 }
 0x169   :  { %v3306_v12 = vpop.eup %3305 }
 0x16a   :  { %v202_v13 = vadd.f32 1.0, %v3306_v12 }
 0x16c   :  { %3307 = vrcp.f32 %v202_v13 }
 0x176   :  { %v3308_v14 = vpop.eup %3307 }
 0x177   :  { %v206_v17 = vmul.f32 0.0, %v3308_v14 }
 0x1da   :  { %v209_v15 = vpop.permute.xlu0 %208 }
 0x1db   :  { %v211_v16 = vmul.f32 %v3308_v14, %v209_v15 }
 0x1dd   :  { %213 = vrot.lane.b32.xlu0 %v211_v16, %s3674_s3 }
 0x24f   :  { %v214_v18 = vpop.permute.xlu0 %213 }
 0x250   :  { %v3888_v19 = vadd.f32 %v214_v18, %v206_v17 }
 0x252   :  { %3309 = vtanh.f32 %v3888_v19 }
 0x25c   :  { %v3310_v24 = vpop.eup %3309 }
 0x25d   :  { %219 = vrot.lane.b32.xlu1 %v3310_v24, %s3664_s25 }
 0x2cf   :  { %v220_v25 = vpop.permute.xlu1 %219 }
 0x2d0   :  { %v222_v26 = vmul.f32 %v3308_v14, %v220_v25 }
 0x2d2   :  { %v227_v27 = vpack.c.bf16 %v222_v26, %v222_v26 }
 0x2d4   :  { %233 = vrot.lane.b32.xlu1 %v227_v27, %s3674_s3 }
 0x346   :  { %v234_v28 = vpop.permute.xlu1 %233 }
 0x347   :  { %2944 = vmatmul.mubr.msk.bf16.vlgmr.msra.gmra.mrb[0].mxu1 %vm154_vm1, %v234_v28 }
 0x348   :  { %2956 = vmatpush3.bf16.msra.mxu1 %v3870_v1  ;;  %2959 = vmatprep.mubr.msk.bf16.mxu1 %vm3672_vm0, %v3671_v0 }
 0x349   :  { %2957 = vmatprep.subr.bf16.mxu1 %v3671_v0 }
 0x34c   :  { %2958 = vmatpush3.bf16.msra.mxu1 %v3876_v2 }
 0x34d   :  { %2971 = vmatprep.subr.bf16.mxu1 %v3671_v0 }
 0x34f   :  { %2960 = vmatmul.mubr.msk.bf16.vlgmr.msra.gmra.mrb[4].mxu1 %vm154_vm1, %v234_v28 }
 0x350   :  { %2972 = vmatpush3.bf16.msra.mxu1 %v3893_v21  ;;  %2975 = vmatprep.mubr.msk.bf16.mxu1 %vm3672_vm0, %v3671_v0 }
 0x351   :  { %2973 = vmatprep.subr.bf16.mxu1 %v3671_v0 }
 0x354   :  { %2974 = vmatpush3.bf16.msra.mxu1 %v3899_v23 }
 0x355   :  { %2987 = vmatprep.subr.bf16.mxu1 %v3671_v0 }
 0x41a   :  { %v284_v33 = vpop.f32.mrb[0].mxu1 }
 0x41b   :  { %v337_v35 = vadd.f32 %v336_v29, %v284_v33  ;;  %v2945_v36 = vpop.f32.mrb[1].mxu1  ;;  %v2738_v29 = vld [vmem:[%s4445_s0 + $0x4] sm:$0x3] }
 0x41c   :  { %v287_v37 = vpop.f32.mrb[2].mxu1 }
 0x41d   :  { %v349_v38 = vadd.f32 %v3929_v34, %v337_v35  ;;  %v2946_v39 = vpop.f32.mrb[3].mxu1 }
 0x41f   :  { %3311 = vtanh.f32 %v349_v38  ;;  %v2731_v48 = vmul.f32 -1.442695, %v349_v38 }
 0x422   :  { %v410_v41 = vpop.f32.mrb[4].mxu1 }
 0x423   :  { %v416_v42 = vadd.f32 %v2732_v40, %v410_v41  ;;  %v2961_v43 = vpop.f32.mrb[5].mxu1 }
 0x424   :  { %v413_v44 = vpop.f32.mrb[6].mxu1 }
 0x425   :  { %3313 = vtanh.f32 %v416_v42  ;;  %v2962_v45 = vpop.f32.mrb[7].mxu1  ;;  %v2734_v49 = vmul.f32 -1.442695, %v416_v42 }
 0x426   :  { %3315 = vpow2.f32 %v2731_v48 }
 0x427   :  { %3317 = vpow2.f32 %v2734_v49 }
 0x429   :  { %v3312_v46 = vpop.eup %3311 }
 0x42a   :  { %359 = vrot.lane.b32.xlu1 %v3312_v46, %s3664_s25 }
 0x42f   :  { %v3314_v47 = vpop.eup %3313 }
 0x430   :  { %426 = vrot.lane.b32.xlu0 %v3314_v47, %s3664_s25  ;;  %v3316_v50 = vpop.eup %3315 }
 0x431   :  { %v353_v51 = vadd.f32 1.0, %v3316_v50  ;;  %v3318_v52 = vpop.eup %3317 }
 0x432   :  { %v420_v53 = vadd.f32 1.0, %v3318_v52 }
 0x433   :  { %3319 = vrcp.f32 %v353_v51 }
 0x434   :  { %3321 = vrcp.f32 %v420_v53 }
 0x43d   :  { %v3320_v54 = vpop.eup %3319 }
 0x43e   :  { %v3322_v57 = vpop.eup %3321  ;;  %v357_v60 = vmul.f32 0.0, %v3320_v54 }
 0x43f   :  { %v424_v63 = vmul.f32 %v3322_v57, %v3888_v19 }
 0x49c   :  { %v360_v55 = vpop.permute.xlu1 %359 }
 0x49d   :  { %v362_v56 = vmul.f32 %v3320_v54, %v360_v55 }
 0x49f   :  { %364 = vrot.lane.b32.xlu1 %v362_v56, %s3674_s3 }
 0x4a2   :  { %v427_v58 = vpop.permute.xlu0 %426 }
 0x4a3   :  { %v429_v59 = vmul.f32 %v3322_v57, %v427_v58 }
 0x4a5   :  { %431 = vrot.lane.b32.xlu0 %v429_v59, %s3674_s3 }
 0x511   :  { %v365_v61 = vpop.permute.xlu1 %364 }
 0x512   :  { %v3939_v62 = vadd.f32 %v365_v61, %v357_v60 }
 0x514   :  { %3323 = vtanh.f32 %v3939_v62 }
 0x517   :  { %v432_v3 = vpop.permute.xlu0 %431 }
 0x518   :  { %v3943_v4 = vadd.f32 %v432_v3, %v424_v63 }
 0x51a   :  { %3325 = vtanh.f32 %v3943_v4 }
 0x51e   :  { %v3324_v5 = vpop.eup %3323 }
 0x51f   :  { %370 = vrot.lane.b32.xlu1 %v3324_v5, %s3664_s25 }
 0x524   :  { %v3326_v6 = vpop.eup %3325 }
 0x525   :  { %437 = vrot.lane.b32.xlu0 %v3326_v6, %s3664_s25 }
 0x591   :  { %v371_v7 = vpop.permute.xlu1 %370 }
 0x592   :  { %v373_v8 = vmul.f32 %v3320_v54, %v371_v7 }
 0x594   :  { %v441_v9 = vpack.c.bf16 %v373_v8, %v373_v8 }
 0x596   :  { %490 = vrot.lane.b32.xlu1 %v441_v9, %s3674_s3 }
 0x597   :  { %v438_v10 = vpop.permute.xlu0 %437 }
 0x598   :  { %v440_v11 = vmul.f32 %v3322_v57, %v438_v10 }
 0x59a   :  { %v442_v12 = vpack.c.bf16 %v440_v11, %v440_v11 }
 0x59c   :  { %444 = vrot.lane.b32.xlu0 %v442_v12, %s3674_s3 }
 0x608   :  { %v491_v13 = vpop.permute.xlu1 %490 }
 0x609   :  { %2976 = vmatmul.mubr.msk.bf16.vlgmr.msra.gmra.mrb[8].mxu1 %vm154_vm1, %v491_v13 }
 0x60a   :  { %2988 = vmatpush3.bf16.msra.mxu1 %v3891_v20  ;;  %2991 = vmatprep.mubr.msk.bf16.mxu1 %vm3672_vm0, %v3671_v0 }
 0x60b   :  { %2989 = vmatprep.subr.bf16.mxu1 %v3671_v0 }
 0x60e   :  { %v445_v14 = vpop.permute.xlu0 %444  ;;  %2990 = vmatpush3.bf16.msra.mxu1 %v3897_v22 }
 0x60f   :  { %2968 = vmatmul.mubr.msk.bf16.vlgmr.msra.gmra.mrb[8].mxu0 %vm154_vm1, %v445_v14  ;;  %3003 = vmatprep.subr.bf16.mxu1 %v3671_v0 }
 0x610   :  { %2980 = vmatpush3.bf16.msra.mxu0 %v3870_v1  ;;  %2983 = vmatprep.mubr.msk.bf16.mxu0 %vm3672_vm0, %v3671_v0 }
 0x611   :  { %2981 = vmatprep.subr.bf16.mxu0 %v3671_v0 }
 0x614   :  { %2982 = vmatpush3.bf16.msra.mxu0 %v3876_v2 }
 0x615   :  { %2995 = vmatprep.subr.bf16.mxu0 %v3671_v0 }
 0x617   :  { %2984 = vmatmul.mubr.msk.bf16.vlgmr.msra.gmra.mrb[12].mxu0 %vm154_vm1, %v445_v14 }
 0x618   :  { %2996 = vmatpush3.bf16.msra.mxu0 %v3893_v21  ;;  %2999 = vmatprep.mubr.msk.bf16.mxu0 %vm3672_vm0, %v3671_v0 }
 0x619   :  { %2997 = vmatprep.subr.bf16.mxu0 %v3671_v0 }
 0x61c   :  { %2998 = vmatpush3.bf16.msra.mxu0 %v3899_v23 }
 0x61d   :  { %3011 = vmatprep.subr.bf16.mxu0 %v3671_v0 }
 0x6dc   :  { %v529_v15 = vpop.f32.mrb[8].mxu1 }
 0x6dd   :  { %v2977_v16 = vpop.f32.mrb[9].mxu1 }
 0x6de   :  { %v532_v17 = vpop.f32.mrb[10].mxu1 }
 0x6df   :  { %v2978_v18 = vpop.f32.mrb[11].mxu1 }
 0x6e2   :  { %v483_v19 = vpop.f32.mrb[8].mxu0 }
 0x6e3   :  { %v530_v24 = vadd.f32 %v529_v15, %v483_v19  ;;  %v2969_v25 = vpop.f32.mrb[9].mxu0  ;;  %v2744_v15 = vld [vmem:[%s4445_s0 + $0x6] sm:$0x3] }
 0x6e4   :  { %v486_v26 = vpop.f32.mrb[10].mxu0 }
 0x6e5   :  { %v535_v27 = vadd.f32 %v3929_v34, %v530_v24  ;;  %v2970_v28 = vpop.f32.mrb[11].mxu0 }
 0x6e7   :  { %3327 = vtanh.f32 %v535_v27  ;;  %v2737_v38 = vmul.f32 -1.442695, %v535_v27 }
 0x6ea   :  { %v596_v30 = vpop.f32.mrb[12].mxu0 }
 0x6eb   :  { %v602_v31 = vadd.f32 %v2738_v29, %v596_v30  ;;  %v2985_v32 = vpop.f32.mrb[13].mxu0 }
 0x6ec   :  { %v599_v33 = vpop.f32.mrb[14].mxu0 }
 0x6ed   :  { %3329 = vtanh.f32 %v602_v31  ;;  %v2986_v35 = vpop.f32.mrb[15].mxu0  ;;  %v2740_v39 = vmul.f32 -1.442695, %v602_v31 }
 0x6ee   :  { %3331 = vpow2.f32 %v2737_v38 }
 0x6ef   :  { %3333 = vpow2.f32 %v2740_v39 }
 0x6f1   :  { %v3328_v36 = vpop.eup %3327 }
 0x6f2   :  { %545 = vrot.lane.b32.xlu1 %v3328_v36, %s3664_s25 }
 0x6f7   :  { %v3330_v37 = vpop.eup %3329 }
 0x6f8   :  { %612 = vrot.lane.b32.xlu0 %v3330_v37, %s3664_s25  ;;  %v3332_v40 = vpop.eup %3331 }
 0x6f9   :  { %v539_v41 = vadd.f32 1.0, %v3332_v40  ;;  %v3334_v42 = vpop.eup %3333 }
 0x6fa   :  { %v606_v43 = vadd.f32 1.0, %v3334_v42 }
 0x6fb   :  { %3335 = vrcp.f32 %v539_v41 }
 0x6fc   :  { %3337 = vrcp.f32 %v606_v43 }
 0x705   :  { %v3336_v44 = vpop.eup %3335 }
 0x706   :  { %v3338_v47 = vpop.eup %3337  ;;  %v543_v50 = vmul.f32 %v3336_v44, %v3939_v62 }
 0x707   :  { %v610_v53 = vmul.f32 %v3338_v47, %v3943_v4 }
 0x764   :  { %v546_v45 = vpop.permute.xlu1 %545 }
 0x765   :  { %v548_v46 = vmul.f32 %v3336_v44, %v546_v45 }
 0x767   :  { %550 = vrot.lane.b32.xlu1 %v548_v46, %s3674_s3 }
 0x76a   :  { %v613_v48 = vpop.permute.xlu0 %612 }
 0x76b   :  { %v615_v49 = vmul.f32 %v3338_v47, %v613_v48 }
 0x76d   :  { %617 = vrot.lane.b32.xlu0 %v615_v49, %s3674_s3 }
 0x7d9   :  { %v551_v51 = vpop.permute.xlu1 %550 }
 0x7da   :  { %v3980_v52 = vadd.f32 %v551_v51, %v543_v50 }
 0x7dc   :  { %3339 = vtanh.f32 %v3980_v52 }
 0x7df   :  { %v618_v54 = vpop.permute.xlu0 %617 }
 0x7e0   :  { %v3984_v55 = vadd.f32 %v618_v54, %v610_v53 }
 0x7e2   :  { %3341 = vtanh.f32 %v3984_v55 }
 0x7e6   :  { %v3340_v56 = vpop.eup %3339 }
 0x7e7   :  { %556 = vrot.lane.b32.xlu1 %v3340_v56, %s3664_s25 }
 0x7ec   :  { %v3342_v57 = vpop.eup %3341 }
 0x7ed   :  { %623 = vrot.lane.b32.xlu0 %v3342_v57, %s3664_s25 }
 0x859   :  { %v557_v58 = vpop.permute.xlu1 %556 }
 0x85a   :  { %v559_v59 = vmul.f32 %v3336_v44, %v557_v58 }
 0x85c   :  { %v627_v60 = vpack.c.bf16 %v559_v59, %v559_v59 }
 0x85e   :  { %676 = vrot.lane.b32.xlu1 %v627_v60, %s3674_s3 }
 0x85f   :  { %v624_v61 = vpop.permute.xlu0 %623 }
 0x860   :  { %v626_v62 = vmul.f32 %v3338_v47, %v624_v61 }
 0x862   :  { %v628_v63 = vpack.c.bf16 %v626_v62, %v626_v62 }
 0x864   :  { %630 = vrot.lane.b32.xlu0 %v628_v63, %s3674_s3 }
 0x8d0   :  { %v677_v3 = vpop.permute.xlu1 %676 }
 0x8d1   :  { %3000 = vmatmul.mubr.msk.bf16.vlgmr.msra.gmra.mrb[16].mxu0 %vm154_vm1, %v677_v3 }
 0x8d2   :  { %3012 = vmatpush3.bf16.msra.mxu0 %v3891_v20  ;;  %3015 = vmatprep.mubr.msk.bf16.mxu0 %vm3672_vm0, %v3671_v0 }
 0x8d3   :  { %3013 = vmatprep.subr.bf16.mxu0 %v3671_v0 }
 0x8d6   :  { %v631_v4 = vpop.permute.xlu0 %630  ;;  %3014 = vmatpush3.bf16.msra.mxu0 %v3897_v22 }
 0x8d7   :  { %2992 = vmatmul.mubr.msk.bf16.vlgmr.msra.gmra.mrb[12].mxu1 %vm154_vm1, %v631_v4  ;;  %3027 = vmatprep.subr.bf16.mxu0 %v3671_v0 }
 0x8d8   :  { %3004 = vmatpush3.bf16.msra.mxu1 %v3870_v1  ;;  %3007 = vmatprep.mubr.msk.bf16.mxu1 %vm3672_vm0, %v3671_v0 }
 0x8d9   :  { %3005 = vmatprep.subr.bf16.mxu1 %v3671_v0 }
 0x8dc   :  { %3006 = vmatpush3.bf16.msra.mxu1 %v3876_v2 }
 0x8dd   :  { %3019 = vmatprep.subr.bf16.mxu1 %v3671_v0 }
 0x8df   :  { %3008 = vmatmul.mubr.msk.bf16.vlgmr.msra.gmra.mrb[16].mxu1 %vm154_vm1, %v631_v4 }
 0x8e0   :  { %3020 = vmatpush3.bf16.msra.mxu1 %v3893_v21  ;;  %3023 = vmatprep.mubr.msk.bf16.mxu1 %vm3672_vm0, %v3671_v0 }
 0x8e1   :  { %3021 = vmatprep.subr.bf16.mxu1 %v3671_v0 }
 0x8e4   :  { %3022 = vmatpush3.bf16.msra.mxu1 %v3899_v23 }
 0x8e5   :  { %3035 = vmatprep.subr.bf16.mxu1 %v3671_v0 }
 0x9a4   :  { %v715_v5 = vpop.f32.mrb[16].mxu0 }
 0x9a5   :  { %v3001_v6 = vpop.f32.mrb[17].mxu0 }
 0x9a6   :  { %v718_v7 = vpop.f32.mrb[18].mxu0 }
 0x9a7   :  { %v3002_v8 = vpop.f32.mrb[19].mxu0 }
 0x9aa   :  { %v669_v9 = vpop.f32.mrb[12].mxu1 }
 0x9ab   :  { %v716_v10 = vadd.f32 %v715_v5, %v669_v9  ;;  %v2993_v11 = vpop.f32.mrb[13].mxu1  ;;  %v2750_v5 = vld [vmem:[%s4445_s0 + $0x8] sm:$0x3] }
 0x9ac   :  { %v672_v12 = vpop.f32.mrb[14].mxu1 }
 0x9ad   :  { %v721_v13 = vadd.f32 %v3929_v34, %v716_v10  ;;  %v2994_v14 = vpop.f32.mrb[15].mxu1 }
 0x9af   :  { %3343 = vtanh.f32 %v721_v13  ;;  %v2743_v27 = vmul.f32 -1.442695, %v721_v13 }
 0x9b2   :  { %v782_v16 = vpop.f32.mrb[16].mxu1 }
 0x9b3   :  { %v788_v17 = vadd.f32 %v2744_v15, %v782_v16  ;;  %v3009_v18 = vpop.f32.mrb[17].mxu1 }
 0x9b4   :  { %v785_v19 = vpop.f32.mrb[18].mxu1 }
 0x9b5   :  { %3345 = vtanh.f32 %v788_v17  ;;  %v3010_v24 = vpop.f32.mrb[19].mxu1  ;;  %v2746_v28 = vmul.f32 -1.442695, %v788_v17 }
 0x9b6   :  { %3347 = vpow2.f32 %v2743_v27 }
 0x9b7   :  { %3349 = vpow2.f32 %v2746_v28 }
 0x9b9   :  { %v3344_v25 = vpop.eup %3343 }
 0x9ba   :  { %731 = vrot.lane.b32.xlu1 %v3344_v25, %s3664_s25 }
 0x9bf   :  { %v3346_v26 = vpop.eup %3345 }
 0x9c0   :  { %798 = vrot.lane.b32.xlu0 %v3346_v26, %s3664_s25  ;;  %v3348_v29 = vpop.eup %3347 }
 0x9c1   :  { %v725_v30 = vadd.f32 1.0, %v3348_v29  ;;  %v3350_v31 = vpop.eup %3349 }
 0x9c2   :  { %v792_v32 = vadd.f32 1.0, %v3350_v31 }
 0x9c3   :  { %3351 = vrcp.f32 %v725_v30 }
 0x9c4   :  { %3353 = vrcp.f32 %v792_v32 }
 0x9cd   :  { %v3352_v33 = vpop.eup %3351 }
 0x9ce   :  { %v3354_v37 = vpop.eup %3353  ;;  %v729_v40 = vmul.f32 %v3352_v33, %v3980_v52 }
 0x9cf   :  { %v796_v43 = vmul.f32 %v3354_v37, %v3984_v55 }
 0xa2c   :  { %v732_v35 = vpop.permute.xlu1 %731 }
 0xa2d   :  { %v734_v36 = vmul.f32 %v3352_v33, %v732_v35 }
 0xa2f   :  { %736 = vrot.lane.b32.xlu1 %v734_v36, %s3674_s3 }
 0xa32   :  { %v799_v38 = vpop.permute.xlu0 %798 }
 0xa33   :  { %v801_v39 = vmul.f32 %v3354_v37, %v799_v38 }
 0xa35   :  { %803 = vrot.lane.b32.xlu0 %v801_v39, %s3674_s3 }
 0xaa1   :  { %v737_v41 = vpop.permute.xlu1 %736 }
 0xaa2   :  { %v4021_v42 = vadd.f32 %v737_v41, %v729_v40 }
 0xaa4   :  { %3355 = vtanh.f32 %v4021_v42 }
 0xaa7   :  { %v804_v44 = vpop.permute.xlu0 %803 }
 0xaa8   :  { %v4025_v45 = vadd.f32 %v804_v44, %v796_v43 }
 0xaaa   :  { %3357 = vtanh.f32 %v4025_v45 }
 0xaae   :  { %v3356_v46 = vpop.eup %3355 }
 0xaaf   :  { %742 = vrot.lane.b32.xlu1 %v3356_v46, %s3664_s25 }
 0xab4   :  { %v3358_v47 = vpop.eup %3357 }
 0xab5   :  { %809 = vrot.lane.b32.xlu0 %v3358_v47, %s3664_s25 }
 0xb21   :  { %v743_v48 = vpop.permute.xlu1 %742 }
 0xb22   :  { %v745_v49 = vmul.f32 %v3352_v33, %v743_v48 }
 0xb24   :  { %v813_v50 = vpack.c.bf16 %v745_v49, %v745_v49 }
 0xb26   :  { %862 = vrot.lane.b32.xlu1 %v813_v50, %s3674_s3 }
 0xb27   :  { %v810_v51 = vpop.permute.xlu0 %809 }
 0xb28   :  { %v812_v52 = vmul.f32 %v3354_v37, %v810_v51 }
 0xb2a   :  { %v814_v53 = vpack.c.bf16 %v812_v52, %v812_v52 }
 0xb2c   :  { %816 = vrot.lane.b32.xlu0 %v814_v53, %s3674_s3 }
 0xb98   :  { %v863_v54 = vpop.permute.xlu1 %862 }
 0xb99   :  { %3024 = vmatmul.mubr.msk.bf16.vlgmr.msra.gmra.mrb[20].mxu1 %vm154_vm1, %v863_v54 }
 0xb9a   :  { %3036 = vmatpush3.bf16.msra.mxu1 %v3891_v20  ;;  %3039 = vmatprep.mubr.msk.bf16.mxu1 %vm3672_vm0, %v3671_v0 }
 0xb9b   :  { %3037 = vmatprep.subr.bf16.mxu1 %v3671_v0 }
 0xb9e   :  { %v817_v55 = vpop.permute.xlu0 %816  ;;  %3038 = vmatpush3.bf16.msra.mxu1 %v3897_v22 }
 0xb9f   :  { %3016 = vmatmul.mubr.msk.bf16.vlgmr.msra.gmra.mrb[20].mxu0 %vm154_vm1, %v817_v55  ;;  %3051 = vmatprep.subr.bf16.mxu1 %v3671_v0 }
 0xba0   :  { %3028 = vmatpush3.bf16.msra.mxu0 %v3870_v1  ;;  %3031 = vmatprep.mubr.msk.bf16.mxu0 %vm3672_vm0, %v3671_v0 }
 0xba1   :  { %3029 = vmatprep.subr.bf16.mxu0 %v3671_v0 }
 0xba4   :  { %3030 = vmatpush3.bf16.msra.mxu0 %v3876_v2 }
 0xba5   :  { %3043 = vmatprep.subr.bf16.mxu0 %v3671_v0 }
 0xba7   :  { %3032 = vmatmul.mubr.msk.bf16.vlgmr.msra.gmra.mrb[24].mxu0 %vm154_vm1, %v817_v55 }
 0xba8   :  { %3044 = vmatpush3.bf16.msra.mxu0 %v3893_v21  ;;  %3047 = vmatprep.mubr.msk.bf16.mxu0 %vm3672_vm0, %v3671_v0 }
 0xba9   :  { %3045 = vmatprep.subr.bf16.mxu0 %v3671_v0 }
 0xbac   :  { %3046 = vmatpush3.bf16.msra.mxu0 %v3899_v23 }
 0xbad   :  { %3059 = vmatprep.subr.bf16.mxu0 %v3671_v0 }
 0xc6c   :  { %v901_v56 = vpop.f32.mrb[20].mxu1 }
 0xc6d   :  { %v3025_v57 = vpop.f32.mrb[21].mxu1 }
 0xc6e   :  { %v904_v58 = vpop.f32.mrb[22].mxu1 }
 0xc6f   :  { %v3026_v59 = vpop.f32.mrb[23].mxu1 }
 0xc72   :  { %v855_v60 = vpop.f32.mrb[20].mxu0 }
 0xc73   :  { %v902_v61 = vadd.f32 %v901_v56, %v855_v60  ;;  %v3017_v62 = vpop.f32.mrb[21].mxu0  ;;  %v2756_v56 = vld [vmem:[%s4445_s0 + $0xa] sm:$0x3] }
 0xc74   :  { %v858_v63 = vpop.f32.mrb[22].mxu0 }
 0xc75   :  { %v907_v3 = vadd.f32 %v3929_v34, %v902_v61  ;;  %v3018_v4 = vpop.f32.mrb[23].mxu0 }
 0xc77   :  { %3359 = vtanh.f32 %v907_v3  ;;  %v2749_v13 = vmul.f32 -1.442695, %v907_v3 }
 0xc7a   :  { %v968_v6 = vpop.f32.mrb[24].mxu0 }
 0xc7b   :  { %v974_v7 = vadd.f32 %v2750_v5, %v968_v6  ;;  %v3033_v8 = vpop.f32.mrb[25].mxu0 }
 0xc7c   :  { %v971_v9 = vpop.f32.mrb[26].mxu0 }
 0xc7d   :  { %3361 = vtanh.f32 %v974_v7  ;;  %v3034_v10 = vpop.f32.mrb[27].mxu0  ;;  %v2752_v14 = vmul.f32 -1.442695, %v974_v7 }
 0xc7e   :  { %3363 = vpow2.f32 %v2749_v13 }
 0xc7f   :  { %3365 = vpow2.f32 %v2752_v14 }
 0xc81   :  { %v3360_v11 = vpop.eup %3359 }
 0xc82   :  { %917 = vrot.lane.b32.xlu1 %v3360_v11, %s3664_s25 }
 0xc87   :  { %v3362_v12 = vpop.eup %3361 }
 0xc88   :  { %984 = vrot.lane.b32.xlu0 %v3362_v12, %s3664_s25  ;;  %v3364_v15 = vpop.eup %3363 }
 0xc89   :  { %v911_v16 = vadd.f32 1.0, %v3364_v15  ;;  %v3366_v17 = vpop.eup %3365 }
 0xc8a   :  { %v978_v18 = vadd.f32 1.0, %v3366_v17 }
 0xc8b   :  { %3367 = vrcp.f32 %v911_v16 }
 0xc8c   :  { %3369 = vrcp.f32 %v978_v18 }
 0xc95   :  { %v3368_v19 = vpop.eup %3367 }
 0xc96   :  { %v3370_v26 = vpop.eup %3369  ;;  %v915_v29 = vmul.f32 %v3368_v19, %v4021_v42 }
 0xc97   :  { %v982_v32 = vmul.f32 %v3370_v26, %v4025_v45 }
 0xcf4   :  { %v918_v24 = vpop.permute.xlu1 %917 }
 0xcf5   :  { %v920_v25 = vmul.f32 %v3368_v19, %v918_v24 }
 0xcf7   :  { %922 = vrot.lane.b32.xlu1 %v920_v25, %s3674_s3 }
 0xcfa   :  { %v985_v27 = vpop.permute.xlu0 %984 }
 0xcfb   :  { %v987_v28 = vmul.f32 %v3370_v26, %v985_v27 }
 0xcfd   :  { %989 = vrot.lane.b32.xlu0 %v987_v28, %s3674_s3 }
 0xd69   :  { %v923_v30 = vpop.permute.xlu1 %922 }
 0xd6a   :  { %v4062_v31 = vadd.f32 %v923_v30, %v915_v29 }
 0xd6c   :  { %3371 = vtanh.f32 %v4062_v31 }
 0xd6f   :  { %v990_v33 = vpop.permute.xlu0 %989 }
 0xd70   :  { %v4066_v35 = vadd.f32 %v990_v33, %v982_v32 }
 0xd72   :  { %3373 = vtanh.f32 %v4066_v35 }
 0xd76   :  { %v3372_v36 = vpop.eup %3371 }
 0xd77   :  { %928 = vrot.lane.b32.xlu1 %v3372_v36, %s3664_s25 }
 0xd7c   :  { %v3374_v37 = vpop.eup %3373 }
 0xd7d   :  { %995 = vrot.lane.b32.xlu0 %v3374_v37, %s3664_s25 }
 0xde9   :  { %v929_v38 = vpop.permute.xlu1 %928 }
 0xdea   :  { %v931_v39 = vmul.f32 %v3368_v19, %v929_v38 }
 0xdec   :  { %v999_v40 = vpack.c.bf16 %v931_v39, %v931_v39 }
 0xdee   :  { %1048 = vrot.lane.b32.xlu1 %v999_v40, %s3674_s3 }
 0xdef   :  { %v996_v41 = vpop.permute.xlu0 %995 }
 0xdf0   :  { %v998_v42 = vmul.f32 %v3370_v26, %v996_v41 }
 0xdf2   :  { %v1000_v43 = vpack.c.bf16 %v998_v42, %v998_v42 }
 0xdf4   :  { %1002 = vrot.lane.b32.xlu0 %v1000_v43, %s3674_s3  ;;  %v2762_v43 = vld [vmem:[%s4445_s0 + $0xc] sm:$0x3] }
 0xe60   :  { %v1049_v44 = vpop.permute.xlu1 %1048 }
 0xe61   :  { %3048 = vmatmul.mubr.msk.bf16.vlgmr.msra.gmra.mrb[28].mxu0 %vm154_vm1, %v1049_v44 }
 0xe62   :  { %3060 = vmatpush3.bf16.msra.mxu0 %v3891_v20  ;;  %3063 = vmatprep.mubr.msk.bf16.mxu0 %vm3672_vm0, %v3671_v0 }
 0xe63   :  { %3061 = vmatprep.subr.bf16.mxu0 %v3671_v0 }
 0xe66   :  { %v1003_v45 = vpop.permute.xlu0 %1002  ;;  %3062 = vmatpush3.bf16.msra.mxu0 %v3897_v22 }
 0xe67   :  { %3040 = vmatmul.mubr.msk.bf16.vlgmr.msra.gmra.mrb[24].mxu1 %vm154_vm1, %v1003_v45  ;;  %3075 = vmatprep.subr.bf16.mxu0 %v3671_v0 }
 0xe68   :  { %3052 = vmatpush3.bf16.msra.mxu1 %v3870_v1  ;;  %3055 = vmatprep.mubr.msk.bf16.mxu1 %vm3672_vm0, %v3671_v0 }
 0xe69   :  { %3053 = vmatprep.subr.bf16.mxu1 %v3671_v0 }
 0xe6c   :  { %3054 = vmatpush3.bf16.msra.mxu1 %v3876_v2 }
 0xe6d   :  { %3067 = vmatprep.subr.bf16.mxu1 %v3671_v0 }
 0xe6f   :  { %3056 = vmatmul.mubr.msk.bf16.vlgmr.msra.gmra.mrb[28].mxu1 %vm154_vm1, %v1003_v45 }
 0xe70   :  { %3068 = vmatpush3.bf16.msra.mxu1 %v3893_v21  ;;  %3071 = vmatprep.mubr.msk.bf16.mxu1 %vm3672_vm0, %v3671_v0 }
 0xe71   :  { %3069 = vmatprep.subr.bf16.mxu1 %v3671_v0 }
 0xe74   :  { %3070 = vmatpush3.bf16.msra.mxu1 %v3899_v23 }
 0xe75   :  { %3083 = vmatprep.subr.bf16.mxu1 %v3671_v0 }
 0xf34   :  { %v1087_v46 = vpop.f32.mrb[28].mxu0 }
 0xf35   :  { %v3049_v47 = vpop.f32.mrb[29].mxu0 }
 0xf36   :  { %v1090_v48 = vpop.f32.mrb[30].mxu0 }
 0xf37   :  { %v3050_v49 = vpop.f32.mrb[31].mxu0 }
 0xf3a   :  { %v1041_v50 = vpop.f32.mrb[24].mxu1 }
 0xf3b   :  { %v1088_v51 = vadd.f32 %v1087_v46, %v1041_v50  ;;  %v3041_v52 = vpop.f32.mrb[25].mxu1 }
 0xf3c   :  { %v1044_v53 = vpop.f32.mrb[26].mxu1 }
 0xf3d   :  { %v1093_v54 = vadd.f32 %v3929_v34, %v1088_v51  ;;  %v3042_v55 = vpop.f32.mrb[27].mxu1 }
 0xf3f   :  { %3375 = vtanh.f32 %v1093_v54  ;;  %v2755_v3 = vmul.f32 -1.442695, %v1093_v54 }
 0xf42   :  { %v1154_v57 = vpop.f32.mrb[28].mxu1 }
 0xf43   :  { %v1160_v58 = vadd.f32 %v2756_v56, %v1154_v57  ;;  %v3057_v59 = vpop.f32.mrb[29].mxu1 }
 0xf44   :  { %v1157_v60 = vpop.f32.mrb[30].mxu1 }
 0xf45   :  { %3377 = vtanh.f32 %v1160_v58  ;;  %v3058_v61 = vpop.f32.mrb[31].mxu1  ;;  %v2758_v4 = vmul.f32 -1.442695, %v1160_v58 }
 0xf46   :  { %3379 = vpow2.f32 %v2755_v3 }
 0xf47   :  { %3381 = vpow2.f32 %v2758_v4 }
 0xf49   :  { %v3376_v62 = vpop.eup %3375 }
 0xf4a   :  { %1103 = vrot.lane.b32.xlu1 %v3376_v62, %s3664_s25 }
 0xf4f   :  { %v3378_v63 = vpop.eup %3377 }
 0xf50   :  { %1170 = vrot.lane.b32.xlu0 %v3378_v63, %s3664_s25  ;;  %v3380_v5 = vpop.eup %3379 }
 0xf51   :  { %v1097_v6 = vadd.f32 1.0, %v3380_v5  ;;  %v3382_v7 = vpop.eup %3381 }
 0xf52   :  { %v1164_v8 = vadd.f32 1.0, %v3382_v7 }
 0xf53   :  { %3383 = vrcp.f32 %v1097_v6 }
 0xf54   :  { %3385 = vrcp.f32 %v1164_v8 }
 0xf5d   :  { %v3384_v9 = vpop.eup %3383 }
 0xf5e   :  { %v3386_v12 = vpop.eup %3385  ;;  %v1101_v15 = vmul.f32 %v3384_v9, %v4062_v31 }
 0xf5f   :  { %v1168_v18 = vmul.f32 %v3386_v12, %v4066_v35 }
 0xfbc   :  { %v1104_v10 = vpop.permute.xlu1 %1103 }
 0xfbd   :  { %v1106_v11 = vmul.f32 %v3384_v9, %v1104_v10 }
 0xfbf   :  { %1108 = vrot.lane.b32.xlu1 %v1106_v11, %s3674_s3 }
 0xfc2   :  { %v1171_v13 = vpop.permute.xlu0 %1170 }
 0xfc3   :  { %v1173_v14 = vmul.f32 %v3386_v12, %v1171_v13 }
 0xfc5   :  { %1175 = vrot.lane.b32.xlu0 %v1173_v14, %s3674_s3 }
0x1031   :  { %v1109_v16 = vpop.permute.xlu1 %1108 }
0x1032   :  { %v4103_v17 = vadd.f32 %v1109_v16, %v1101_v15 }
0x1034   :  { %3387 = vtanh.f32 %v4103_v17 }
0x1037   :  { %v1176_v19 = vpop.permute.xlu0 %1175 }
0x1038   :  { %v4107_v24 = vadd.f32 %v1176_v19, %v1168_v18  ;;  %v3498_v18 = vld [vmem:[#allocation4 + $0x8] sm:$0xff]  }
0x103a   :  { %3389 = vtanh.f32 %v4107_v24 }
0x103e   :  { %v3388_v25 = vpop.eup %3387 }
0x103f   :  { %1114 = vrot.lane.b32.xlu1 %v3388_v25, %s3664_s25 }
0x1044   :  { %v3390_v26 = vpop.eup %3389 }
0x1045   :  { %1181 = vrot.lane.b32.xlu0 %v3390_v26, %s3664_s25 }
0x10b1   :  { %v1115_v27 = vpop.permute.xlu1 %1114 }
0x10b2   :  { %v1117_v28 = vmul.f32 %v3384_v9, %v1115_v27 }
0x10b4   :  { %v1185_v29 = vpack.c.bf16 %v1117_v28, %v1117_v28 }
0x10b6   :  { %1234 = vrot.lane.b32.xlu1 %v1185_v29, %s3674_s3 }
0x10b7   :  { %v1182_v30 = vpop.permute.xlu0 %1181 }
0x10b8   :  { %v1184_v31 = vmul.f32 %v3386_v12, %v1182_v30 }
0x10ba   :  { %v1186_v32 = vpack.c.bf16 %v1184_v31, %v1184_v31 }
0x10bc   :  { %1188 = vrot.lane.b32.xlu0 %v1186_v32, %s3674_s3 }
0x1128   :  { %v1235_v33 = vpop.permute.xlu1 %1234 }
0x1129   :  { %3072 = vmatmul.mubr.msk.bf16.vlgmr.msra.gmra.mrb[32].mxu1 %vm154_vm1, %v1235_v33  ;;  %v2768_v33 = vld [vmem:[%s4445_s0 + $0xe] sm:$0x3] }
0x112a   :  { %3084 = vmatpush3.bf16.msra.mxu1 %v3891_v20  ;;  %3087 = vmatprep.mubr.msk.bf16.mxu1 %vm3672_vm0, %v3671_v0 }
0x112b   :  { %3085 = vmatprep.subr.bf16.mxu1 %v3671_v0 }
0x112e   :  { %v1189_v35 = vpop.permute.xlu0 %1188  ;;  %3086 = vmatpush3.bf16.msra.mxu1 %v3897_v22 }
0x112f   :  { %3064 = vmatmul.mubr.msk.bf16.vlgmr.msra.gmra.mrb[32].mxu0 %vm154_vm1, %v1189_v35  ;;  %3099 = vmatprep.subr.bf16.mxu1 %v3671_v0 }
0x1130   :  { %3076 = vmatpush3.bf16.msra.mxu0 %v3870_v1  ;;  %3079 = vmatprep.mubr.msk.bf16.mxu0 %vm3672_vm0, %v3671_v0 }
0x1131   :  { %3077 = vmatprep.subr.bf16.mxu0 %v3671_v0 }
0x1134   :  { %3078 = vmatpush3.bf16.msra.mxu0 %v3876_v2 }
0x1135   :  { %3091 = vmatprep.subr.bf16.mxu0 %v3671_v0 }
0x1137   :  { %3080 = vmatmul.mubr.msk.bf16.vlgmr.msra.gmra.mrb[36].mxu0 %vm154_vm1, %v1189_v35 }
0x1138   :  { %3092 = vmatpush3.bf16.msra.mxu0 %v3893_v21  ;;  %3095 = vmatprep.mubr.msk.bf16.mxu0 %vm3672_vm0, %v3671_v0 }
0x1139   :  { %3093 = vmatprep.subr.bf16.mxu0 %v3671_v0 }
0x113c   :  { %3094 = vmatpush3.bf16.msra.mxu0 %v3899_v23 }
0x113d   :  { %3107 = vmatprep.subr.bf16.mxu0 %v3671_v0 }
0x11fc   :  { %v1273_v1 = vpop.f32.mrb[32].mxu1 }
0x11fd   :  { %v3073_v36 = vpop.f32.mrb[33].mxu1 }
0x11fe   :  { %v1276_v37 = vpop.f32.mrb[34].mxu1 }
0x11ff   :  { %v3074_v38 = vpop.f32.mrb[35].mxu1 }
0x1202   :  { %v1227_v2 = vpop.f32.mrb[32].mxu0 }
0x1203   :  { %v1274_v39 = vadd.f32 %v1273_v1, %v1227_v2  ;;  %v3065_v40 = vpop.f32.mrb[33].mxu0 }
0x1204   :  { %v1230_v41 = vpop.f32.mrb[34].mxu0 }
0x1205   :  { %v1279_v42 = vadd.f32 %v3929_v34, %v1274_v39  ;;  %v3066_v21 = vpop.f32.mrb[35].mxu0 }
0x1207   :  { %3391 = vtanh.f32 %v1279_v42  ;;  %v2761_v50 = vmul.f32 -1.442695, %v1279_v42 }
0x120a   :  { %v1340_v44 = vpop.f32.mrb[36].mxu0 }
0x120b   :  { %v1346_v23 = vadd.f32 %v2762_v43, %v1340_v44  ;;  %v3081_v45 = vpop.f32.mrb[37].mxu0 }
0x120c   :  { %v1343_v46 = vpop.f32.mrb[38].mxu0 }
0x120d   :  { %3393 = vtanh.f32 %v1346_v23  ;;  %v3082_v47 = vpop.f32.mrb[39].mxu0  ;;  %v2764_v51 = vmul.f32 -1.442695, %v1346_v23 }
0x120e   :  { %3395 = vpow2.f32 %v2761_v50 }
0x120f   :  { %3397 = vpow2.f32 %v2764_v51 }
0x1211   :  { %v3392_v48 = vpop.eup %3391 }
0x1212   :  { %1289 = vrot.lane.b32.xlu1 %v3392_v48, %s3664_s25 }
0x1217   :  { %v3394_v49 = vpop.eup %3393 }
0x1218   :  { %1356 = vrot.lane.b32.xlu0 %v3394_v49, %s3664_s25  ;;  %v3396_v52 = vpop.eup %3395 }
0x1219   :  { %v1283_v53 = vadd.f32 1.0, %v3396_v52  ;;  %v3398_v54 = vpop.eup %3397 }
0x121a   :  { %v1350_v55 = vadd.f32 1.0, %v3398_v54 }
0x121b   :  { %3399 = vrcp.f32 %v1283_v53 }
0x121c   :  { %3401 = vrcp.f32 %v1350_v55 }
0x1225   :  { %v3400_v56 = vpop.eup %3399 }
0x1226   :  { %v3402_v59 = vpop.eup %3401  ;;  %v1287_v62 = vmul.f32 %v3400_v56, %v4103_v17  ;;  %v3495_v17 = vld [vmem:[%s4446_s1] sm:$0xff]  }
0x1227   :  { %v1354_v4 = vmul.f32 %v3402_v59, %v4107_v24 }
0x1284   :  { %v1290_v57 = vpop.permute.xlu1 %1289 }
0x1285   :  { %v1292_v58 = vmul.f32 %v3400_v56, %v1290_v57 }
0x1287   :  { %1294 = vrot.lane.b32.xlu1 %v1292_v58, %s3674_s3 }
0x128a   :  { %v1357_v60 = vpop.permute.xlu0 %1356 }
0x128b   :  { %v1359_v61 = vmul.f32 %v3402_v59, %v1357_v60 }
0x128d   :  { %1361 = vrot.lane.b32.xlu0 %v1359_v61, %s3674_s3 }
0x12f9   :  { %v1295_v63 = vpop.permute.xlu1 %1294 }
0x12fa   :  { %v4144_v3 = vadd.f32 %v1295_v63, %v1287_v62 }
0x12fc   :  { %3403 = vtanh.f32 %v4144_v3 }
0x12ff   :  { %v1362_v5 = vpop.permute.xlu0 %1361 }
0x1300   :  { %v4148_v6 = vadd.f32 %v1362_v5, %v1354_v4  ;;  %v4211_v5 = vld [vmem:[%s4451_s6 + $0x8] sm:$0xff]  }
0x1302   :  { %3405 = vtanh.f32 %v4148_v6 }
0x1306   :  { %v3404_v7 = vpop.eup %3403 }
0x1307   :  { %1300 = vrot.lane.b32.xlu1 %v3404_v7, %s3664_s25 }
0x130c   :  { %v3406_v8 = vpop.eup %3405 }
0x130d   :  { %1367 = vrot.lane.b32.xlu0 %v3406_v8, %s3664_s25 }
0x1379   :  { %v1301_v9 = vpop.permute.xlu1 %1300 }
0x137a   :  { %v1303_v10 = vmul.f32 %v3400_v56, %v1301_v9 }
0x137c   :  { %v1371_v11 = vpack.c.bf16 %v1303_v10, %v1303_v10 }
0x137e   :  { %1420 = vrot.lane.b32.xlu1 %v1371_v11, %s3674_s3 }
0x137f   :  { %v1368_v12 = vpop.permute.xlu0 %1367 }
0x1380   :  { %v1370_v13 = vmul.f32 %v3402_v59, %v1368_v12 }
0x1382   :  { %v1372_v14 = vpack.c.bf16 %v1370_v13, %v1370_v13 }
0x1384   :  { %1374 = vrot.lane.b32.xlu0 %v1372_v14, %s3674_s3  ;;  %v3499_v14 = vld [vmem:[#allocation6] ss:$0 sm:$0xff] }
0x13f0   :  { %v1421_v15 = vpop.permute.xlu1 %1420 }
0x13f1   :  { %3096 = vmatmul.mubr.msk.bf16.vlgmr.msra.gmra.mrb[40].mxu0 %vm154_vm1, %v1421_v15 }
0x13f2   :  { %3108 = vmatpush3.bf16.msra.mxu0 %v3891_v20  ;;  %3111 = vmatprep.mubr.msk.bf16.mxu0 %vm3672_vm0, %v3671_v0  ;;  %v3496_v20 = vld [vmem:[%s4446_s1 + $0x8] sm:$0xff]  }
0x13f3   :  { %3109 = vmatprep.subr.bf16.mxu0 %v3671_v0 }
0x13f6   :  { %v1375_v16 = vpop.permute.xlu0 %1374  ;;  %3110 = vmatpush3.bf16.msra.mxu0 %v3897_v22  ;;  %v3497_v22 = vld [vmem:[#allocation4] sm:$0xff]  }
0x13f7   :  { %3088 = vmatmul.mubr.msk.bf16.vlgmr.msra.gmra.mrb[36].mxu1 %vm154_vm1, %v1375_v16  ;;  %3123 = vmatprep.subr.bf16.mxu0 %v3671_v0 }
0x13f8   :  { %3100 = vmatpush3.bf16.msra.mxu1 %v3495_v17  ;;  %3103 = vmatprep.mubr.msk.bf16.mxu1 %vm3672_vm0, %v3671_v0  ;;  %v1676_v17 = vld [vmem:[#allocation7] sm:$0x3] }
0x13f9   :  { %3101 = vmatprep.subr.bf16.mxu1 %v3671_v0 }
0x13fc   :  { %3102 = vmatpush3.bf16.msra.mxu1 %v3496_v20 }
0x13fd   :  { %3115 = vmatprep.subr.bf16.mxu1 %v3671_v0 }
0x13ff   :  { %3104 = vmatmul.mubr.msk.bf16.vlgmr.msra.gmra.mrb[40].mxu1 %vm154_vm1, %v1375_v16 }
0x1400   :  { %3116 = vmatpush3.bf16.msra.mxu1 %v3497_v22  ;;  %3119 = vmatprep.mubr.msk.bf16.mxu1 %vm3672_vm0, %v3671_v0 }
0x1401   :  { %3117 = vmatprep.subr.bf16.mxu1 %v3671_v0 }
0x1404   :  { %3118 = vmatpush3.bf16.msra.mxu1 %v3498_v18 }
0x1405   :  { %3131 = vmatprep.subr.bf16.mxu1 %v3671_v0 }
0x14c4   :  { %v1459_v19 = vpop.f32.mrb[40].mxu0 }
0x14c5   :  { %v3097_v24 = vpop.f32.mrb[41].mxu0 }
0x14c6   :  { %v1462_v25 = vpop.f32.mrb[42].mxu0 }
0x14c7   :  { %v3098_v26 = vpop.f32.mrb[43].mxu0 }
0x14ca   :  { %v1413_v27 = vpop.f32.mrb[36].mxu1 }
0x14cb   :  { %v1460_v28 = vadd.f32 %v1459_v19, %v1413_v27  ;;  %v3089_v29 = vpop.f32.mrb[37].mxu1 }
0x14cc   :  { %v1416_v30 = vpop.f32.mrb[38].mxu1 }
0x14cd   :  { %v1465_v31 = vadd.f32 %v3929_v34, %v1460_v28  ;;  %v3090_v32 = vpop.f32.mrb[39].mxu1 }
0x14cf   :  { %3407 = vtanh.f32 %v1465_v31  ;;  %v2767_v40 = vmul.f32 -1.442695, %v1465_v31 }
0x14d2   :  { %v1526_v35 = vpop.f32.mrb[40].mxu1 }
0x14d3   :  { %v1532_v1 = vadd.f32 %v2768_v33, %v1526_v35  ;;  %v3105_v36 = vpop.f32.mrb[41].mxu1 }
0x14d4   :  { %v1529_v37 = vpop.f32.mrb[42].mxu1 }
0x14d5   :  { %3409 = vtanh.f32 %v1532_v1  ;;  %v3106_v38 = vpop.f32.mrb[43].mxu1  ;;  %v2770_v34 = vmul.f32 -1.442695, %v1532_v1 }
0x14d6   :  { %3411 = vpow2.f32 %v2767_v40 }
0x14d7   :  { %3413 = vpow2.f32 %v2770_v34 }
0x14d9   :  { %v3408_v2 = vpop.eup %3407 }
0x14da   :  { %1475 = vrot.lane.b32.xlu1 %v3408_v2, %s3664_s25 }
0x14df   :  { %v3410_v39 = vpop.eup %3409 }
0x14e0   :  { %1542 = vrot.lane.b32.xlu0 %v3410_v39, %s3664_s25  ;;  %v3412_v41 = vpop.eup %3411 }
0x14e1   :  { %v1469_v42 = vadd.f32 1.0, %v3412_v41  ;;  %v3414_v21 = vpop.eup %3413 }
0x14e2   :  { %v1536_v43 = vadd.f32 1.0, %v3414_v21  ;;  %v4233_v21 = vld [vmem:[#allocation12] sm:$0xff]  }
0x14e3   :  { %3415 = vrcp.f32 %v1469_v42 }
0x14e4   :  { %3417 = vrcp.f32 %v1536_v43  ;;  %v4238_v43 = vld [vmem:[%s4454_s9] sm:$0xff]  }
0x14ed   :  { %v3416_v44 = vpop.eup %3415 }
0x14ee   :  { %v3418_v46 = vpop.eup %3417  ;;  %v1473_v49 = vmul.f32 %v3416_v44, %v4144_v3  ;;  %v4204_v3 = vld [vmem:[%s4451_s6] sm:$0xff]  }
0x14ef   :  { %v1540_v52 = vmul.f32 %v3418_v46, %v4148_v6 }
0x154c   :  { %v1476_v23 = vpop.permute.xlu1 %1475 }
0x154d   :  { %v1478_v45 = vmul.f32 %v3416_v44, %v1476_v23  ;;  %v4241_v23 = vld [vmem:[#allocation12 + $0x8] sm:$0xff]  }
0x154f   :  { %1480 = vrot.lane.b32.xlu1 %v1478_v45, %s3674_s3 }
0x1552   :  { %v1543_v47 = vpop.permute.xlu0 %1542 }
0x1553   :  { %v1545_v48 = vmul.f32 %v3418_v46, %v1543_v47 }
0x1555   :  { %1547 = vrot.lane.b32.xlu0 %v1545_v48, %s3674_s3 }
0x15c1   :  { %v1481_v50 = vpop.permute.xlu1 %1480 }
0x15c2   :  { %v4187_v51 = vadd.f32 %v1481_v50, %v1473_v49 }
0x15c4   :  { %3419 = vtanh.f32 %v4187_v51 }
0x15c7   :  { %v1548_v53 = vpop.permute.xlu0 %1547 }
0x15c8   :  { %v4191_v54 = vadd.f32 %v1548_v53, %v1540_v52 }
0x15ca   :  { %3421 = vtanh.f32 %v4191_v54 }
0x15ce   :  { %v3420_v55 = vpop.eup %3419 }
0x15cf   :  { %1486 = vrot.lane.b32.xlu1 %v3420_v55, %s3664_s25 }
0x15d4   :  { %v3422_v56 = vpop.eup %3421 }
0x15d5   :  { %1553 = vrot.lane.b32.xlu0 %v3422_v56, %s3664_s25 }
0x1641   :  { %v1487_v57 = vpop.permute.xlu1 %1486 }
0x1642   :  { %v1489_v58 = vmul.f32 %v3416_v44, %v1487_v57 }
0x1644   :  { %v1557_v59 = vpack.c.bf16 %v1489_v58, %v1489_v58 }
0x1646   :  { %1606 = vrot.lane.b32.xlu1 %v1557_v59, %s3674_s3 }
0x1647   :  { %v1554_v60 = vpop.permute.xlu0 %1553 }
0x1648   :  { %v1556_v61 = vmul.f32 %v3418_v46, %v1554_v60  ;;  %v4253_v46 = vld [vmem:[%s4454_s9 + $0x8] sm:$0xff]   ;;  %v4272_v60 = vld [vmem:[%s4456_s11] ss:$0 sm:$0xff] }
0x164a   :  { %v1558_v62 = vpack.c.bf16 %v1556_v61, %v1556_v61 }
0x164c   :  { %1560 = vrot.lane.b32.xlu0 %v1558_v62, %s3674_s3 }
0x16b8   :  { %v1607_v63 = vpop.permute.xlu1 %1606 }
0x16b9   :  { %3120 = vmatmul.mubr.msk.bf16.vlgmr.msra.gmra.mrb[44].mxu1 %vm154_vm1, %v1607_v63 }
0x16ba   :  { %3135 = vmatprep.mubr.msk.bf16.mxu1 %vm3672_vm0, %v3671_v0  ;;  %3132 = vmatpush3.bf16.msra.mxu1 %v4238_v43 }
0x16bb   :  { %3133 = vmatprep.subr.bf16.mxu1 %v3671_v0 }
0x16be   :  { %v1561_v4 = vpop.permute.xlu0 %1560  ;;  %3134 = vmatpush3.bf16.msra.mxu1 %v4253_v46 }
0x16bf   :  { %3112 = vmatmul.mubr.msk.bf16.vlgmr.msra.gmra.mrb[44].mxu0 %vm154_vm1, %v1561_v4  ;;  %3147 = vmatprep.subr.bf16.mxu1 %v3671_v0 }
0x16c0   :  { %3124 = vmatpush3.bf16.msra.mxu0 %v4204_v3  ;;  %3127 = vmatprep.mubr.msk.bf16.mxu0 %vm3672_vm0, %v3671_v0 }
0x16c1   :  { %3125 = vmatprep.subr.bf16.mxu0 %v3671_v0 }
0x16c4   :  { %3126 = vmatpush3.bf16.msra.mxu0 %v4211_v5 }
0x16c5   :  { %3139 = vmatprep.subr.bf16.mxu0 %v3671_v0 }
0x16c7   :  { %3128 = vmatmul.mubr.msk.bf16.vlgmr.msra.gmra.mrb[48].mxu0 %vm154_vm1, %v1561_v4 }
0x16c8   :  { %3143 = vmatprep.mubr.msk.bf16.mxu0 %vm3672_vm0, %v3671_v0  ;;  %3140 = vmatpush3.bf16.msra.mxu0 %v4233_v21 }
0x16c9   :  { %3141 = vmatprep.subr.bf16.mxu0 %v3671_v0 }
0x16cc   :  { %3142 = vmatpush3.bf16.msra.mxu0 %v4241_v23 }
0x16cd   :  { %3163 = vmatprep.subr.bf16.mxu0 %v3671_v0 }
0x178c   :  { %v1645_v6 = vpop.f32.mrb[44].mxu1 }
0x178d   :  { %v3121_v7 = vpop.f32.mrb[45].mxu1 }
0x178e   :  { %v1648_v8 = vpop.f32.mrb[46].mxu1 }
0x178f   :  { %v3122_v9 = vpop.f32.mrb[47].mxu1 }
0x1792   :  { %v1599_v10 = vpop.f32.mrb[44].mxu0 }
0x1793   :  { %v1646_v11 = vadd.f32 %v1645_v6, %v1599_v10  ;;  %v3113_v12 = vpop.f32.mrb[45].mxu0 }
0x1794   :  { %v1602_v13 = vpop.f32.mrb[46].mxu0 }
0x1795   :  { %v1651_v15 = vadd.f32 %v3499_v14, %v1646_v11  ;;  %v3114_v16 = vpop.f32.mrb[47].mxu0 }
0x1797   :  { %3423 = vtanh.f32 %v1651_v15  ;;  %v2773_v27 = vmul.f32 -1.442695, %v1651_v15 }
0x179a   :  { %v1727_v20 = vpop.f32.mrb[48].mxu0 }
0x179b   :  { %v1733_v22 = vadd.f32 %v1727_v20, %v1676_v17  ;;  %v3129_v18 = vpop.f32.mrb[49].mxu0  ;;  %v4281_v17 = vld [vmem:[#allocation9] sm:$0xff]   ;;  %v4284_v20 = vld [vmem:[#allocation9 + $0x8] sm:$0xff]  }
0x179c   :  { %v1730_v19 = vpop.f32.mrb[50].mxu0 }
0x179d   :  { %3425 = vtanh.f32 %v1733_v22  ;;  %v3130_v24 = vpop.f32.mrb[51].mxu0  ;;  %v2777_v28 = vmul.f32 -1.442695, %v1733_v22 }
0x179e   :  { %3427 = vpow2.f32 %v2773_v27 }
0x179f   :  { %3429 = vpow2.f32 %v2777_v28 }
0x17a1   :  { %v3424_v25 = vpop.eup %3423 }
0x17a2   :  { %1661 = vrot.lane.b32.xlu0 %v3424_v25, %s3664_s25 }
0x17a7   :  { %v3426_v26 = vpop.eup %3425 }
0x17a8   :  { %1743 = vrot.lane.b32.xlu1 %v3426_v26, %s3664_s25  ;;  %v3428_v29 = vpop.eup %3427  ;;  %v4309_v26 = vld [vmem:[#allocation10] ss:$0 sm:$0xff] }
0x17a9   :  { %v1655_v30 = vadd.f32 1.0, %v3428_v29  ;;  %v3430_v31 = vpop.eup %3429 }
0x17aa   :  { %v1737_v32 = vadd.f32 1.0, %v3430_v31 }
0x17ab   :  { %3431 = vrcp.f32 %v1655_v30 }
0x17ac   :  { %3433 = vrcp.f32 %v1737_v32 }
0x17b5   :  { %v3432_v33 = vpop.eup %3431 }
0x17b6   :  { %v3434_v36 = vpop.eup %3433  ;;  %v1659_v2 = vmul.f32 %v3432_v33, %v4187_v51 }
0x17b7   :  { %v1741_v34 = vmul.f32 %v3434_v36, %v4191_v54 }
0x1814   :  { %v1662_v35 = vpop.permute.xlu0 %1661 }
0x1815   :  { %v1664_v1 = vmul.f32 %v3432_v33, %v1662_v35 }
0x1817   :  { %1666 = vrot.lane.b32.xlu0 %v1664_v1, %s3674_s3 }
0x181a   :  { %v1744_v37 = vpop.permute.xlu1 %1743 }
0x181b   :  { %v1746_v38 = vmul.f32 %v3434_v36, %v1744_v37 }
0x181d   :  { %1748 = vrot.lane.b32.xlu1 %v1746_v38, %s3674_s3 }
0x1889   :  { %v1667_v39 = vpop.permute.xlu0 %1666 }
0x188a   :  { %v4226_v40 = vadd.f32 %v1667_v39, %v1659_v2 }
0x188c   :  { %3435 = vtanh.f32 %v4226_v40 }
0x188f   :  { %v1749_v41 = vpop.permute.xlu1 %1748 }
0x1890   :  { %v4230_v42 = vadd.f32 %v1749_v41, %v1741_v34 }
0x1892   :  { %3437 = vtanh.f32 %v4230_v42 }
0x1896   :  { %v3436_v44 = vpop.eup %3435 }
0x1897   :  { %1672 = vrot.lane.b32.xlu0 %v3436_v44, %s3664_s25 }
0x189c   :  { %v3438_v45 = vpop.eup %3437 }
0x189d   :  { %1754 = vrot.lane.b32.xlu1 %v3438_v45, %s3664_s25 }
0x1909   :  { %v1673_v47 = vpop.permute.xlu0 %1672 }
0x190a   :  { %v1675_v48 = vmul.f32 %v3432_v33, %v1673_v47 }
0x190c   :  { %v1758_v49 = vpack.c.bf16 %v1675_v48, %v1675_v48 }
0x190e   :  { %1827 = vrot.lane.b32.xlu1 %v1758_v49, %s3674_s3 }
0x190f   :  { %v1755_v50 = vpop.permute.xlu1 %1754 }
0x1910   :  { %v1757_v51 = vmul.f32 %v3434_v36, %v1755_v50 }
0x1912   :  { %v1763_v52 = vpack.c.bf16 %v1757_v51, %v1757_v51 }
0x1914   :  { %1769 = vrot.lane.b32.xlu0 %v1763_v52, %s3674_s3 }
0x1980   :  { %v1828_v53 = vpop.permute.xlu1 %1827 }
0x1981   :  { %3144 = vmatmul.mubr.msk.bf16.vlgmr.msra.gmra.mrb[52].mxu0 %vm154_vm1, %v1828_v53 }
0x1982   :  { %3164 = vmatpush3.bf16.msra.mxu0 %v4238_v43  ;;  %3167 = vmatprep.mubr.msk.bf16.mxu0 %vm3672_vm0, %v3671_v0 }
0x1983   :  { %3165 = vmatprep.subr.bf16.mxu0 %v3671_v0 }
0x1986   :  { %v1770_v54 = vpop.permute.xlu0 %1769  ;;  %3166 = vmatpush3.bf16.msra.mxu0 %v4253_v46 }
0x1987   :  { %3136 = vmatmul.mubr.msk.bf16.vlgmr.msra.gmra.mrb[48].mxu1 %vm154_vm1, %v1770_v54  ;;  %3171 = vmatprep.subr.bf16.mxu0 %v3671_v0 }
0x1988   :  { %3151 = vmatprep.mubr.msk.bf16.mxu1 %vm3672_vm0, %v3671_v0  ;;  %3148 = vmatpush3.bf16.msra.mxu1 %v4281_v17 }
0x1989   :  { %3149 = vmatprep.subr.bf16.mxu1 %v3671_v0 }
0x198c   :  { %3150 = vmatpush3.bf16.msra.mxu1 %v4284_v20 }
0x198d   :  { %3155 = vmatprep.subr.bf16.mxu1 %v3671_v0 }
0x1a54   :  { %v1878_v55 = vpop.f32.mrb[52].mxu0 }
0x1a55   :  { %v3145_v56 = vpop.f32.mrb[53].mxu0 }
0x1a56   :  { %v1881_v57 = vpop.f32.mrb[54].mxu0 }
0x1a57   :  { %v3146_v58 = vpop.f32.mrb[55].mxu0 }
0x1a5a   :  { %v1820_v59 = vpop.f32.mrb[48].mxu1 }
0x1a5b   :  { %v1879_v61 = vadd.f32 %v1878_v55, %v1820_v59  ;;  %v3137_v62 = vpop.f32.mrb[49].mxu1 }
0x1a5c   :  { %v1823_v63 = vpop.f32.mrb[50].mxu1 }
0x1a5d   :  { %v1891_v4 = vadd.f32 %v4272_v60, %v1879_v61  ;;  %v3138_v6 = vpop.f32.mrb[51].mxu1 }
0x1a5f   :  { %3439 = vtanh.f32 %v1891_v4  ;;  %v2785_v8 = vmul.f32 -1.442695, %v1891_v4 }
0x1a61   :  { %3441 = vpow2.f32 %v2785_v8 }
0x1a69   :  { %v3440_v7 = vpop.eup %3439 }
0x1a6a   :  { %1901 = vrot.lane.b32.xlu0 %v3440_v7, %s3664_s25 }
0x1a6b   :  { %v3442_v9 = vpop.eup %3441 }
0x1a6c   :  { %v1895_v10 = vadd.f32 1.0, %v3442_v9 }
0x1a6e   :  { %3443 = vrcp.f32 %v1895_v10 }
0x1a78   :  { %v3444_v11 = vpop.eup %3443 }
0x1a79   :  { %v1899_v14 = vmul.f32 %v3444_v11, %v4226_v40 }
0x1adc   :  { %v1902_v12 = vpop.permute.xlu0 %1901 }
0x1add   :  { %v1904_v13 = vmul.f32 %v3444_v11, %v1902_v12 }
0x1adf   :  { %1906 = vrot.lane.b32.xlu1 %v1904_v13, %s3674_s3 }
0x1b51   :  { %v1907_v15 = vpop.permute.xlu1 %1906 }
0x1b52   :  { %v4278_v16 = vadd.f32 %v1907_v15, %v1899_v14 }
0x1b54   :  { %3445 = vtanh.f32 %v4278_v16 }
0x1b5e   :  { %v3446_v22 = vpop.eup %3445 }
0x1b5f   :  { %1912 = vrot.lane.b32.xlu0 %v3446_v22, %s3664_s25 }
0x1bd1   :  { %v1913_v18 = vpop.permute.xlu0 %1912 }
0x1bd2   :  { %v4290_v19 = vmul.f32 %v3444_v11, %v1913_v18 }
0x1bd4   :  { %v1916_v24 = vpack.c.bf16 %v4290_v19, %v4290_v19 }
0x1bd6   :  { %1929 = vrot.lane.b32.xlu1 %v1916_v24, %s3674_s3 }
0x1c48   :  { %v1930_v25 = vpop.permute.xlu1 %1929 }
0x1c49   :  { %3152 = vmatmul.mubr.msk.bf16.vlgmr.msra.gmra.mrb[52].mxu1 %vm154_vm1, %v1930_v25 }
0x1c4a   :  { %3156 = vmatpush3.bf16.msra.mxu1 %v4204_v3  ;;  %3159 = vmatprep.mubr.msk.bf16.mxu1 %vm3672_vm0, %v3671_v0 }
0x1c4b   :  { %3157 = vmatprep.subr.bf16.mxu1 %v3671_v0 }
0x1c4e   :  { %3158 = vmatpush3.bf16.msra.mxu1 %v4211_v5 }
0x1c4f   :  { %3179 = vmatprep.subr.bf16.mxu1 %v3671_v0 }
0x1c55   :  { %3160 = vmatmul.mubr.msk.bf16.vlgmr.msra.gmra.mrb[52].mxu1 %vm154_vm1, %v1770_v54 }
0x1c56   :  { %3180 = vmatpush3.bf16.msra.mxu1 %v4281_v17  ;;  %3183 = vmatprep.mubr.msk.bf16.mxu1 %vm3672_vm0, %v3671_v0 }
0x1c57   :  { %3181 = vmatprep.subr.bf16.mxu1 %v3671_v0 }
0x1c5a   :  { %3182 = vmatpush3.bf16.msra.mxu1 %v4284_v20 }
0x1c5b   :  { %3187 = vmatprep.subr.bf16.mxu1 %v3671_v0 }
0x1d28   :  { %v2020_v27 = vpop.f32.mrb[52].mxu1 }
0x1d29   :  { %v3260_v28 = vadd.f32 %v4309_v26, %v2020_v27  ;;  %v3161_v29 = vpop.f32.mrb[53].mxu1 }
0x1d2a   :  { %v2023_v30 = vpop.f32.mrb[54].mxu1 }
0x1d2b   :  { %3447 = vtanh.f32 %v3260_v28  ;;  %v3162_v31 = vpop.f32.mrb[55].mxu1  ;;  %v2791_v33 = vmul.f32 -1.442695, %v3260_v28 }
0x1d2d   :  { %3449 = vpow2.f32 %v2791_v33 }
0x1d35   :  { %v3448_v32 = vpop.eup %3447 }
0x1d36   :  { %2036 = vrot.lane.b32.xlu0 %v3448_v32, %s3664_s25 }
0x1d37   :  { %v3450_v35 = vpop.eup %3449 }
0x1d38   :  { %v2030_v1 = vadd.f32 1.0, %v3450_v35 }
0x1d3a   :  { %3451 = vrcp.f32 %v2030_v1 }
0x1d44   :  { %v3452_v36 = vpop.eup %3451 }
0x1d45   :  { %v2034_v2 = vmul.f32 %v3452_v36, %v4230_v42 }
0x1da8   :  { %v2037_v37 = vpop.permute.xlu0 %2036 }
0x1da9   :  { %v2039_v38 = vmul.f32 %v3452_v36, %v2037_v37 }
0x1dab   :  { %2041 = vrot.lane.b32.xlu1 %v2039_v38, %s3674_s3 }
0x1e1d   :  { %v2042_v39 = vpop.permute.xlu1 %2041 }
0x1e1e   :  { %v4315_v40 = vadd.f32 %v2042_v39, %v2034_v2 }
0x1e20   :  { %3453 = vtanh.f32 %v4315_v40 }
0x1e2a   :  { %v3454_v34 = vpop.eup %3453 }
0x1e2b   :  { %2047 = vrot.lane.b32.xlu0 %v3454_v34, %s3664_s25 }
0x1e9d   :  { %v2048_v41 = vpop.permute.xlu0 %2047 }
0x1e9e   :  { %v2050_v44 = vmul.f32 %v3452_v36, %v2048_v41 }
0x1ea0   :  { %v2051_v45 = vpack.c.bf16 %v2050_v44, %v2050_v44 }
0x1ea2   :  { %2053 = vrot.lane.b32.xlu1 %v2051_v45, %s3674_s3 }
0x1f14   :  { %v2054_v47 = vpop.permute.xlu1 %2053 }
0x1f15   :  { %3168 = vmatmul.mubr.msk.bf16.vlgmr.msra.gmra.mrb[56].mxu0 %vm154_vm1, %v2054_v47 }
0x1f16   :  { %3172 = vmatpush3.bf16.msra.mxu0 %v4233_v21  ;;  %3175 = vmatprep.mubr.msk.bf16.mxu0 %vm3672_vm0, %v3671_v0 }
0x1f17   :  { %3173 = vmatprep.subr.bf16.mxu0 %v3671_v0 }
0x1f1a   :  { %3174 = vmatpush3.bf16.msra.mxu0 %v4241_v23 }
0x1f1b   :  { %3195 = vmatprep.subr.bf16.mxu0 %v3671_v0 }
0x1f1d   :  { %3176 = vmatmul.mubr.msk.bf16.vlgmr.msra.gmra.mrb[60].mxu0 %vm154_vm1, %v1930_v25 }
0x1f1e   :  { %3196 = vmatpush3.bf16.msra.mxu0 %v4238_v43  ;;  %3199 = vmatprep.mubr.msk.bf16.mxu0 %vm3672_vm0, %v3671_v0 }
0x1f1f   :  { %3197 = vmatprep.subr.bf16.mxu0 %v3671_v0 }
0x1f22   :  { %3198 = vmatpush3.bf16.msra.mxu0 %v4253_v46 }
0x1f23   :  { %3203 = vmatprep.subr.bf16.mxu0 %v3671_v0 }
0x1fe8   :  { %v2092_v42 = vpop.f32.mrb[56].mxu0 }
0x1fe9   :  { %v3169_v48 = vpop.f32.mrb[57].mxu0 }
0x1fea   :  { %v2095_v49 = vpop.f32.mrb[58].mxu0 }
0x1feb   :  { %v3170_v50 = vpop.f32.mrb[59].mxu0 }
0x1ff0   :  { %v2132_v51 = vpop.f32.mrb[60].mxu0 }
0x1ff1   :  { %v2133_v52 = vadd.f32 %v2132_v51, %v2092_v42  ;;  %v3177_v53 = vpop.f32.mrb[61].mxu0 }
0x1ff2   :  { %v2135_v54 = vpop.f32.mrb[62].mxu0 }
0x1ff3   :  { %v2138_v55 = vadd.f32 %v4272_v60, %v2133_v52  ;;  %v3178_v56 = vpop.f32.mrb[63].mxu0 }
0x1ff5   :  { %3455 = vtanh.f32 %v2138_v55  ;;  %v2794_v58 = vmul.f32 -1.442695, %v2138_v55 }
0x1ff7   :  { %3457 = vpow2.f32 %v2794_v58 }
0x1fff   :  { %v3456_v57 = vpop.eup %3455 }
0x2000   :  { %2148 = vrot.lane.b32.xlu0 %v3456_v57, %s3664_s25 }
0x2001   :  { %v3458_v59 = vpop.eup %3457 }
0x2002   :  { %v2142_v61 = vadd.f32 1.0, %v3458_v59 }
0x2004   :  { %3459 = vrcp.f32 %v2142_v61 }
0x200e   :  { %v3460_v62 = vpop.eup %3459 }
0x200f   :  { %v2146_v6 = vmul.f32 %v3460_v62, %v4278_v16 }
0x2072   :  { %v2149_v63 = vpop.permute.xlu0 %2148 }
0x2073   :  { %v2151_v4 = vmul.f32 %v3460_v62, %v2149_v63 }
0x2075   :  { %2153 = vrot.lane.b32.xlu1 %v2151_v4, %s3674_s3 }
0x20e7   :  { %v2154_v7 = vpop.permute.xlu1 %2153 }
0x20e8   :  { %v4338_v8 = vadd.f32 %v2154_v7, %v2146_v6 }
0x20ea   :  { %3461 = vtanh.f32 %v4338_v8 }
0x20f4   :  { %v3462_v9 = vpop.eup %3461 }
0x20f5   :  { %2159 = vrot.lane.b32.xlu0 %v3462_v9, %s3664_s25 }
0x2167   :  { %v2160_v10 = vpop.permute.xlu0 %2159 }
0x2168   :  { %v4342_v11 = vmul.f32 %v3460_v62, %v2160_v10 }
0x216a   :  { %v2163_v12 = vpack.c.bf16 %v4342_v11, %v4342_v11  ;;  %v2612_v57 = vrot.slane %v4342_v11, 6 }
0x216c   :  { %2165 = vrot.lane.b32.xlu1 %v2163_v12, %s3674_s3  ;;  %v2621_v63 = vsel %vm2620_vm2, %v4290_v19, %v2612_v57 }
0x21de   :  { %v2166_v13 = vpop.permute.xlu1 %2165 }
0x21df   :  { %3184 = vmatmul.mubr.msk.bf16.vlgmr.msra.gmra.mrb[56].mxu1 %vm154_vm1, %v2166_v13 }
0x21e0   :  { %3188 = vmatpush3.bf16.msra.mxu1 %v4204_v3  ;;  %3191 = vmatprep.mubr.msk.bf16.mxu1 %vm3672_vm0, %v3671_v0 }
0x21e1   :  { %3189 = vmatprep.subr.bf16.mxu1 %v3671_v0 }
0x21e4   :  { %3190 = vmatpush3.bf16.msra.mxu1 %v4211_v5 }
0x21e5   :  { %3211 = vmatprep.subr.bf16.mxu1 %v3671_v0 }
0x21eb   :  { %3192 = vmatmul.mubr.msk.bf16.vlgmr.msra.gmra.mrb[56].mxu1 %vm154_vm1, %v2054_v47 }
0x21ec   :  { %3212 = vmatpush3.bf16.msra.mxu1 %v4281_v17  ;;  %3215 = vmatprep.mubr.msk.bf16.mxu1 %vm3672_vm0, %v3671_v0 }
0x21ed   :  { %3213 = vmatprep.subr.bf16.mxu1 %v3671_v0 }
0x21f0   :  { %3214 = vmatpush3.bf16.msra.mxu1 %v4284_v20 }
0x21f1   :  { %3219 = vmatprep.subr.bf16.mxu1 %v3671_v0 }
0x22be   :  { %v2244_v14 = vpop.f32.mrb[56].mxu1 }
0x22bf   :  { %v3261_v15 = vadd.f32 %v4309_v26, %v2244_v14  ;;  %v3193_v16 = vpop.f32.mrb[57].mxu1 }
0x22c0   :  { %v2247_v22 = vpop.f32.mrb[58].mxu1 }
0x22c1   :  { %3463 = vtanh.f32 %v3261_v15  ;;  %v3194_v18 = vpop.f32.mrb[59].mxu1  ;;  %v2797_v17 = vmul.f32 -1.442695, %v3261_v15 }
0x22c3   :  { %3465 = vpow2.f32 %v2797_v17 }
0x22cb   :  { %v3464_v24 = vpop.eup %3463 }
0x22cc   :  { %2260 = vrot.lane.b32.xlu0 %v3464_v24, %s3664_s25 }
0x22cd   :  { %v3466_v25 = vpop.eup %3465 }
0x22ce   :  { %v2254_v27 = vadd.f32 1.0, %v3466_v25 }
0x22d0   :  { %3467 = vrcp.f32 %v2254_v27 }
0x22da   :  { %v3468_v28 = vpop.eup %3467 }
0x22db   :  { %v2258_v30 = vmul.f32 %v3468_v28, %v4315_v40 }
0x233e   :  { %v2261_v29 = vpop.permute.xlu0 %2260 }
0x233f   :  { %v2263_v20 = vmul.f32 %v3468_v28, %v2261_v29 }
0x2341   :  { %2265 = vrot.lane.b32.xlu1 %v2263_v20, %s3674_s3 }
0x23b3   :  { %v2266_v31 = vpop.permute.xlu1 %2265 }
0x23b4   :  { %v4365_v32 = vadd.f32 %v2266_v31, %v2258_v30 }
0x23b6   :  { %3469 = vtanh.f32 %v4365_v32 }
0x23c0   :  { %v3470_v33 = vpop.eup %3469 }
0x23c1   :  { %2271 = vrot.lane.b32.xlu0 %v3470_v33, %s3664_s25 }
0x2433   :  { %v2272_v35 = vpop.permute.xlu0 %2271 }
0x2434   :  { %v2274_v1 = vmul.f32 %v3468_v28, %v2272_v35 }
0x2436   :  { %v2275_v36 = vpack.c.bf16 %v2274_v1, %v2274_v1 }
0x2438   :  { %2277 = vrot.lane.b32.xlu1 %v2275_v36, %s3674_s3 }
0x24aa   :  { %v2278_v37 = vpop.permute.xlu1 %2277 }
0x24ab   :  { %3200 = vmatmul.mubr.msk.bf16.vlgmr.msra.gmra.mrb[64].mxu0 %vm154_vm1, %v2278_v37 }
0x24ac   :  { %3204 = vmatpush3.bf16.msra.mxu0 %v4233_v21  ;;  %3207 = vmatprep.mubr.msk.bf16.mxu0 %vm3672_vm0, %v3671_v0 }
0x24ad   :  { %3205 = vmatprep.subr.bf16.mxu0 %v3671_v0 }
0x24b0   :  { %3206 = vmatpush3.bf16.msra.mxu0 %v4241_v23 }
0x24b1   :  { %3227 = vmatprep.subr.bf16.mxu0 %v3671_v0 }
0x24b3   :  { %3208 = vmatmul.mubr.msk.bf16.vlgmr.msra.gmra.mrb[68].mxu0 %vm154_vm1, %v2166_v13 }
0x24b4   :  { %3228 = vmatpush3.bf16.msra.mxu0 %v4238_v43  ;;  %3231 = vmatprep.mubr.msk.bf16.mxu0 %vm3672_vm0, %v3671_v0 }
0x24b5   :  { %3229 = vmatprep.subr.bf16.mxu0 %v3671_v0 }
0x24b8   :  { %3230 = vmatpush3.bf16.msra.mxu0 %v4253_v46 }
0x24b9   :  { %3235 = vmatprep.subr.bf16.mxu0 %v3671_v0 }
0x257e   :  { %v2316_v38 = vpop.f32.mrb[64].mxu0 }
0x257f   :  { %v3201_v2 = vpop.f32.mrb[65].mxu0 }
0x2580   :  { %v2319_v39 = vpop.f32.mrb[66].mxu0 }
0x2581   :  { %v3202_v40 = vpop.f32.mrb[67].mxu0 }
0x2586   :  { %v2356_v34 = vpop.f32.mrb[68].mxu0 }
0x2587   :  { %v2357_v41 = vadd.f32 %v2356_v34, %v2316_v38  ;;  %v3209_v44 = vpop.f32.mrb[69].mxu0 }
0x2588   :  { %v2359_v45 = vpop.f32.mrb[70].mxu0  ;;  %v2627_v44 = vld [vmem:[%s4457_s12 + $0x8] sm:$0xff] }
0x2589   :  { %v2362_v47 = vadd.f32 %v4272_v60, %v2357_v41  ;;  %v3210_v43 = vpop.f32.mrb[71].mxu0  ;;  %v2628_v45 = vld [vmem:[%s4457_s12 + $0x10] sm:$0xff] }
0x258b   :  { %3471 = vtanh.f32 %v2362_v47  ;;  %v2800_v48 = vmul.f32 -1.442695, %v2362_v47  ;;  %v3675_v47 = vmov 0.0|0.0  }
0x258d   :  { %3473 = vpow2.f32 %v2800_v48 }
0x2595   :  { %v3472_v42 = vpop.eup %3471 }
0x2596   :  { %2372 = vrot.lane.b32.xlu0 %v3472_v42, %s3664_s25  ;;  %v2629_v42 = vld [vmem:[%s4457_s12 + $0x18] sm:$0xff] }
0x2597   :  { %v3474_v46 = vpop.eup %3473  ;;  %v3258_v48 = vpack.c.bf16 %v2629_v42, %v2628_v45 }
0x2598   :  { %v2366_v49 = vadd.f32 1.0, %v3474_v46 }
0x259a   :  { %3475 = vrcp.f32 %v2366_v49 }
0x25a4   :  { %v3476_v50 = vpop.eup %3475 }
0x25a5   :  { %v2370_v53 = vmul.f32 %v3476_v50, %v4338_v8 }
0x2608   :  { %v2373_v51 = vpop.permute.xlu0 %2372 }
0x2609   :  { %v2375_v52 = vmul.f32 %v3476_v50, %v2373_v51 }
0x260b   :  { %2377 = vrot.lane.b32.xlu1 %v2375_v52, %s3674_s3 }
0x267d   :  { %v2378_v54 = vpop.permute.xlu1 %2377 }
0x267e   :  { %v4388_v55 = vadd.f32 %v2378_v54, %v2370_v53  ;;  %v2807_v54 = vld [vmem:[%s4458_s13] ss:$0 sm:$0xff] }
0x2680   :  { %3477 = vtanh.f32 %v4388_v55 }
0x268a   :  { %v3478_v56 = vpop.eup %3477 }
0x268b   :  { %2383 = vrot.lane.b32.xlu0 %v3478_v56, %s3664_s25 }
0x26fd   :  { %v2384_v58 = vpop.permute.xlu0 %2383 }
0x26fe   :  { %v2386_v59 = vmul.f32 %v3476_v50, %v2384_v58 }
0x2700   :  { %v2387_v61 = vpack.c.bf16 %v2386_v59, %v2386_v59  ;;  %v2615_v62 = vrot.slane %v2386_v59, 4 }
0x2702   :  { %2389 = vrot.lane.b32.xlu1 %v2387_v61, %s3674_s3  ;;  %v4395_v4 = vsel %vm2622_vm3, %v2621_v63, %v2615_v62 }
0x2774   :  { %v2390_v6 = vpop.permute.xlu1 %2389 }
0x2775   :  { %3216 = vmatmul.mubr.msk.bf16.vlgmr.msra.gmra.mrb[60].mxu1 %vm154_vm1, %v2390_v6 }
0x2776   :  { %3220 = vmatpush3.bf16.msra.mxu1 %v4204_v3  ;;  %3223 = vmatprep.mubr.msk.bf16.mxu1 %vm3672_vm0, %v3671_v0 }
0x2777   :  { %3221 = vmatprep.subr.bf16.mxu1 %v3671_v0 }
0x277a   :  { %3222 = vmatpush3.bf16.msra.mxu1 %v4211_v5 }
0x277b   :  { %3254 = vmatprep.subr.bf16.mxu1 %v3675_v47 }
0x2781   :  { %3224 = vmatmul.mubr.msk.bf16.vlgmr.msra.gmra.mrb[60].mxu1 %vm154_vm1, %v2278_v37 }
0x2782   :  { %3251 = vmatprep.mubr.msk.f32.mxu1 %vm3672_vm0, %v3671_v0 }
0x2854   :  { %v2468_v19 = vpop.f32.mrb[60].mxu1 }
0x2855   :  { %v3262_v7 = vadd.f32 %v4309_v26, %v2468_v19  ;;  %v3225_v8 = vpop.f32.mrb[61].mxu1 }
0x2856   :  { %v2471_v9 = vpop.f32.mrb[62].mxu1 }
0x2857   :  { %3479 = vtanh.f32 %v3262_v7  ;;  %v3226_v10 = vpop.f32.mrb[63].mxu1  ;;  %v2803_v11 = vmul.f32 -1.442695, %v3262_v7 }
0x2859   :  { %3481 = vpow2.f32 %v2803_v11 }
0x2861   :  { %v3480_v3 = vpop.eup %3479 }
0x2862   :  { %2484 = vrot.lane.b32.xlu0 %v3480_v3, %s3664_s25 }
0x2863   :  { %v3482_v12 = vpop.eup %3481 }
0x2864   :  { %v2478_v13 = vadd.f32 1.0, %v3482_v12 }
0x2866   :  { %3483 = vrcp.f32 %v2478_v13 }
0x2870   :  { %v3484_v5 = vpop.eup %3483 }
0x2871   :  { %v2482_v16 = vmul.f32 %v3484_v5, %v4365_v32 }
0x28d4   :  { %v2485_v14 = vpop.permute.xlu0 %2484 }
0x28d5   :  { %v2487_v15 = vmul.f32 %v3484_v5, %v2485_v14 }
0x28d7   :  { %2489 = vrot.lane.b32.xlu1 %v2487_v15, %s3674_s3 }
0x2949   :  { %v2490_v26 = vpop.permute.xlu1 %2489 }
0x294a   :  { %v2492_v22 = vadd.f32 %v2490_v26, %v2482_v16 }
0x294c   :  { %3485 = vtanh.f32 %v2492_v22 }
0x2956   :  { %v3486_v18 = vpop.eup %3485 }
0x2957   :  { %2495 = vrot.lane.b32.xlu0 %v3486_v18, %s3664_s25 }
0x29c9   :  { %v2496_v24 = vpop.permute.xlu0 %2495 }
0x29ca   :  { %v2498_v17 = vmul.f32 %v3484_v5, %v2496_v24 }
0x29cc   :  { %v2499_v25 = vpack.c.bf16 %v2498_v17, %v2498_v17 }
0x29ce   :  { %2501 = vrot.lane.b32.xlu1 %v2499_v25, %s3674_s3 }
0x2a40   :  { %v2502_v27 = vpop.permute.xlu1 %2501 }
0x2a41   :  { %3232 = vmatmul.mubr.msk.bf16.vlgmr.msra.gmra.mrb[72].mxu0 %vm154_vm1, %v2502_v27 }
0x2a42   :  { %3236 = vmatpush3.bf16.msra.mxu0 %v4233_v21  ;;  %3239 = vmatprep.mubr.msk.bf16.mxu0 %vm3672_vm0, %v3671_v0 }
0x2a43   :  { %3237 = vmatprep.subr.bf16.mxu0 %v3671_v0 }
0x2a46   :  { %3238 = vmatpush3.bf16.msra.mxu0 %v4241_v23 }
0x2a49   :  { %3240 = vmatmul.mubr.msk.bf16.vlgmr.msra.gmra.mrb[76].mxu0 %vm154_vm1, %v2390_v6 }
0x2b14   :  { %v2540_v28 = vpop.f32.mrb[72].mxu0 }
0x2b15   :  { %v3233_v29 = vpop.f32.mrb[73].mxu0 }
0x2b16   :  { %v2543_v20 = vpop.f32.mrb[74].mxu0 }
0x2b17   :  { %v3234_v30 = vpop.f32.mrb[75].mxu0 }
0x2b1c   :  { %v2580_v31 = vpop.f32.mrb[76].mxu0 }
0x2b1d   :  { %v2581_v32 = vadd.f32 %v2580_v31, %v2540_v28  ;;  %v3241_v33 = vpop.f32.mrb[77].mxu0 }
0x2b1e   :  { %v2583_v35 = vpop.f32.mrb[78].mxu0 }
0x2b1f   :  { %v2586_v1 = vadd.f32 %v4272_v60, %v2581_v32  ;;  %v3242_v21 = vpop.f32.mrb[79].mxu0  ;;  %v2626_v60 = vld [vmem:[%s4457_s12] sm:$0xff] }
0x2b20   :  { %v3255_v43 = vpack.c.bf16 %v2627_v44, %v2626_v60 }
0x2b21   :  { %3487 = vtanh.f32 %v2586_v1  ;;  %v2806_v0 = vmul.f32 -1.442695, %v2586_v1 }
0x2b22   :  { %3256 = vmatpush3.bf16.msra.mxu1 %v3255_v43 }
0x2b23   :  { %3489 = vpow2.f32 %v2806_v0  ;;  %3257 = vmatprep.subr.bf16.mxu1 %v3675_v47 }
0x2b26   :  { %3259 = vmatpush3.bf16.msra.mxu1 %v3258_v48 }
0x2b2b   :  { %v3488_v36 = vpop.eup %3487 }
0x2b2c   :  { %2596 = vrot.lane.b32.xlu0 %v3488_v36, %s3664_s25 }
0x2b2d   :  { %v3490_v23 = vpop.eup %3489 }
0x2b2e   :  { %v2590_v37 = vadd.f32 1.0, %v3490_v23 }
0x2b30   :  { %3491 = vrcp.f32 %v2590_v37 }
0x2b3a   :  { %v3492_v38 = vpop.eup %3491 }
0x2b3b   :  { %v2594_v40 = vmul.f32 %v3492_v38, %v4388_v55 }
0x2b9e   :  { %v2597_v2 = vpop.permute.xlu0 %2596 }
0x2b9f   :  { %v2599_v39 = vmul.f32 %v3492_v38, %v2597_v2 }
0x2ba1   :  { %2601 = vrot.lane.b32.xlu1 %v2599_v39, %s3674_s3 }
0x2c13   :  { %v2602_v34 = vpop.permute.xlu1 %2601 }
0x2c14   :  { %v2604_v41 = vadd.f32 %v2602_v34, %v2594_v40 }
0x2c16   :  { %3493 = vtanh.f32 %v2604_v41 }
0x2c20   :  { %v3494_v46 = vpop.eup %3493 }
0x2c21   :  { %2607 = vrot.lane.b32.xlu0 %v3494_v46, %s3664_s25 }
0x2c93   :  { %v2608_v49 = vpop.permute.xlu0 %2607 }
0x2c94   :  { %v2610_v50 = vmul.f32 %v3492_v38, %v2608_v49 }
0x2c96   :  { %v2618_v51 = vrot.slane %v2610_v50, 2 }
0x2c98   :  { %v2625_v52 = vsel %vm2624_vm4, %v4395_v4, %v2618_v51 }
0x2c99   :  { %2638 = vrot.lane.b32.xlu1 %v2625_v52, %s3674_s3 }
0x2d0b   :  { %v2639_v53 = vpop.permute.xlu1 %2638 }
0x2d0c   :  { %3252 = vmatmul.mubr.msk.f32.vlgmr.msra.gmra.mrb[64].mxu1 %vm154_vm1, %v2639_v53 }
0x2ddf   :  { %v2708_v55 = vpop.f32.mrb[64].mxu1 }
0x2de0   :  { %v2709_v56 = vadd.f32 %v2807_v54, %v2708_v55  ;;  %v3253_v57 = vpop.f32.mrb[65].mxu1 }
0x2de2   :  { %2713 = vst.msk [vmem:[%s4459_s14] sm:$0xff] %vm2712_vm5, %v2709_v56 }
0x2de3   :  { %2718 = vsyncpa [#allocation3], 1 }
0x2de4   :  { %2719 = vsyncpa [#allocation5], 1 }
0x2de5   :  { %2720 = vsyncpa [#allocation8], 1 }
0x2de6   :  { %2721 = vsyncpa [#allocation11], 1 }

</bundles_post_ra>
